<compile_context>
chip_gen: v5e
topology: v5e:2x2
jax: 0.10.0
libtpu: 0.0.40
codegen_flags: <defaults>
</compile_context>

<pallas_src>
import jax
import jax.numpy as jnp
from jax import lax
from jax.experimental import pallas as pl
from jax.experimental.pallas import tpu as pltpu

LAMBDA_GP = 10.0
N_SHARDS = 2          # leading "parallel" grid axis: both TCs on v7x, harmless elsewhere


# --------------------------------- kernel ----------------------------------
def _gp_kernel(real_ref, fake_ref, inp_ref, alpha_ref, w1a_ref, w1b_ref,
               pre_ref, gram_ref):
    k = pl.program_id(1)          # F-tile index within this shard ("arbitrary")

    @pl.when(k == 0)
    def _init():
        pre_ref[...] = jnp.zeros_like(pre_ref)
        gram_ref[...] = jnp.zeros_like(gram_ref)

    # ---- interpolation on the VPU (f32), strength-reduced form ----
    alpha = alpha_ref[...].astype(jnp.float32)                       # (B, 1)
    real = real_ref[...].astype(jnp.float32)                         # (B, tF)
    fake = fake_ref[...].astype(jnp.float32)                         # (B, tF)
    interp = fake + alpha * (real - fake)                            # (B, tF)

    # ---- feed the MXU bf16, accumulate f32 ----
    w1a = w1a_ref[...]                                               # (tF, HID) bf16
    w1b = w1b_ref[...]                                               # (tF, HID) bf16
    x = inp_ref[...].astype(jnp.bfloat16)                            # (B, tF)
    y = interp.astype(jnp.bfloat16)                                  # (B, tF)

    pre_ref[...] += (jnp.dot(x, w1a, preferred_element_type=jnp.float32)
                     + jnp.dot(y, w1b, preferred_element_type=jnp.float32))
    # Gram accumulation: W1b streamed from HBM exactly once.
    gram_ref[...] += lax.dot_general(
        w1b, w1b, (((0,), (0,)), ((), ())),
        preferred_element_type=jnp.float32)                          # (HID, HID)


# --------------------------------- planning --------------------------------
def _round_up(x, m):
    return -(-x // m) * m


def _plan_f_tiling(F, B, HID, x_bytes, w_bytes, n_shards,
                   tile_budget_bytes=24 * 1024 * 1024, max_tile=4096):
    """Largest 128-multiple F tile whose double-buffered input DMAs fit budget."""
    per_elem = 2 * (2 * HID * w_bytes + 3 * B * x_bytes)   # x2 = double buffering
    cap = max(128, (tile_budget_bytes // per_elem) // 128 * 128)
    cap = min(cap, max_tile)
    need = _round_up(-(-F // n_shards), 128)               # >=1 tile per shard
    tF = min(cap, need)
    F_pad = _round_up(F, tF * n_shards)
    tiles_per_shard = F_pad // (tF * n_shards)
    return tF, F_pad, tiles_per_shard


# --------------------------------- wrapper ---------------------------------
def gradient_penalty_loss(params, real_images, fake_images, input_images, alpha):
    """Returns lambda_gp * mean((||dD/d interp||_2 - 1)^2) as a () f32 scalar."""
    B = real_images.shape[0]
    real_f = real_images.reshape(B, -1)
    fake_f = fake_images.reshape(B, -1)
    inp_f = input_images.reshape(B, -1)
    alpha_f = alpha.reshape(B, 1).astype(jnp.float32)

    # bf16 MXU feed: the big F-sized weights stream as bf16 (half HBM bytes,
    # ~3x MXU throughput); bias / head stay f32 for the JAX epilogue.
    w1a = params["w1a"].astype(jnp.bfloat16)
    w1b = params["w1b"].astype(jnp.bfloat16)
    b1 = params["b1"].astype(jnp.float32)
    w2 = params["w2"].astype(jnp.float32)
    # NOTE: params["b2"] is intentionally unused — it vanishes in dD/d(interp).

    F = real_f.shape[1]
    HID = w1a.shape[1]

    x_bytes = real_f.dtype.itemsize
    w_bytes = w1a.dtype.itemsize
    tF, F_pad, tps = _plan_f_tiling(F, B, HID, x_bytes, w_bytes, N_SHARDS)

    if F_pad != F:
        pad = F_pad - F
        # Zero padding changes neither pre nor the Gram (padded W rows are 0).
        real_f = jnp.pad(real_f, ((0, 0), (0, pad)))
        fake_f = jnp.pad(fake_f, ((0, 0), (0, pad)))
        inp_f = jnp.pad(inp_f, ((0, 0), (0, pad)))
        w1a = jnp.pad(w1a, ((0, pad), (0, 0)))
        w1b = jnp.pad(w1b, ((0, pad), (0, 0)))

    # Tight, generation-safe VMEM limit computed from the real footprint
    # (double-buffered input tiles + double-buffered output blocks + slack),
    # capped at 32 MiB so it is safe on v7x's 64 MiB/TC.
    in_bytes = 2 * tF * (2 * HID * w_bytes + 3 * B * x_bytes) + 2 * B * 4
    out_bytes = 2 * 4 * (HID * HID + B * HID)
    vmem_limit = min(32 * 1024 * 1024,
                     max(in_bytes + out_bytes + 4 * 1024 * 1024,
                         16 * 1024 * 1024))

    pre_parts, gram_parts = pl.pallas_call(
        _gp_kernel,
        out_shape=(jax.ShapeDtypeStruct((N_SHARDS, B, HID), jnp.float32),
                   jax.ShapeDtypeStruct((N_SHARDS, HID, HID), jnp.float32)),
        grid_spec=pltpu.PrefetchScalarGridSpec(
            num_scalar_prefetch=0,
            grid=(N_SHARDS, tps),                           # (parallel, reduction)
            in_specs=[
                pl.BlockSpec((B, tF), lambda c, k: (0, c * tps + k)),     # real
                pl.BlockSpec((B, tF), lambda c, k: (0, c * tps + k)),     # fake
                pl.BlockSpec((B, tF), lambda c, k: (0, c * tps + k)),     # input
                pl.BlockSpec((B, 1), lambda c, k: (0, 0)),                # alpha
                pl.BlockSpec((tF, HID), lambda c, k: (c * tps + k, 0)),   # W1a
                pl.BlockSpec((tF, HID), lambda c, k: (c * tps + k, 0)),   # W1b
            ],
            out_specs=[
                pl.BlockSpec((None, B, HID), lambda c, k: (c, 0, 0)),     # pre partial
                pl.BlockSpec((None, HID, HID), lambda c, k: (c, 0, 0)),   # Gram partial
            ],
        ),
        compiler_params=pltpu.CompilerParams(
            dimension_semantics=("parallel", "arbitrary"),
            vmem_limit_bytes=int(vmem_limit),
        ),
    )(real_f, fake_f, inp_f, alpha_f, w1a, w1b)

    # ---- tiny epilogue in plain JAX (microsecond-scale) ----
    pre = pre_parts.sum(axis=0) + b1                                  # (B, HID)
    gram = gram_parts.sum(axis=0)                                     # (HID, HID)
    h = jnp.tanh(pre)
    g_h = (1.0 - h * h) * w2                                          # (B, HID)
    sq = jnp.sum((g_h @ gram) * g_h, axis=-1)                         # (B,)
    gnorm = jnp.sqrt(jnp.maximum(sq, 0.0))                            # clamp: no NaN at ~0
    return LAMBDA_GP * jnp.mean((gnorm - 1.0) ** 2)


# ----------------------- pure-JAX reference (for checking) -----------------
def _disc_ref(params, x_img, y_img):
    B = x_img.shape[0]
    x = x_img.reshape(B, -1)
    y = y_img.reshape(B, -1)
    h = jnp.tanh(x @ params["w1a"] + y @ params["w1b"] + params["b1"])
    return h @ params["w2"].T + params["b2"]


def _ref_loss(params, real, fake, inp, alpha):
    B = real.shape[0]
    a = alpha.reshape(B, 1, 1, 1)
    interp = a * real + (1.0 - a) * fake

    def f(y):
        return _disc_ref(params, inp, y)

    out, vjp = jax.vjp(f, interp)
    (grads,) = vjp(jnp.ones_like(out))
    g = grads.reshape(B, -1)
    gnorm = jnp.sqrt(jnp.sum(g * g, axis=1))
    return LAMBDA_GP * jnp.mean((gnorm - 1.0) ** 2)


if __name__ == "__main__":
    B, C, H, W = 2, 4, 16, 16
    F = C * H * W            # 1024
    HID = 256

    key = jax.random.PRNGKey(0)
    k = jax.random.split(key, 8)

    real_images = jax.random.normal(k[0], (B, C, H, W), dtype=jnp.float32)
    fake_images = jax.random.normal(k[1], (B, C, H, W), dtype=jnp.float32)
    input_images = jax.random.normal(k[2], (B, C, H, W), dtype=jnp.float32)
    # torch.rand(batch_size, 1, 1, 1) equivalent (drawn in glue, not in-kernel)
    alpha = jax.random.uniform(k[3], (B, 1, 1, 1), dtype=jnp.float32)

    # deterministic synthetic discriminator parameters
    params = {
        "w1a": 0.02 * jax.random.normal(k[4], (F, HID), dtype=jnp.float32),
        "w1b": 0.02 * jax.random.normal(k[5], (F, HID), dtype=jnp.float32),
        "b1": jnp.zeros((1, HID), dtype=jnp.float32),
        "w2": 0.1 * jax.random.normal(k[6], (1, HID), dtype=jnp.float32),
        "b2": jnp.zeros((1, 1), dtype=jnp.float32),
    }

    loss = jax.block_until_ready(
        gradient_penalty_loss(params, real_images, fake_images,
                              input_images, alpha))

    # Reference uses the same bf16-quantized weights the kernel streams to the
    # MXU (f32 math over quantized values); the remaining kernel-vs-ref gap is
    # only in-kernel bf16 activation rounding, hence the 2e-2 tolerance.
    params_q = dict(params)
    params_q["w1a"] = params["w1a"].astype(jnp.bfloat16).astype(jnp.float32)
    params_q["w1b"] = params["w1b"].astype(jnp.bfloat16).astype(jnp.float32)
    ref = jax.block_until_ready(
        _ref_loss(params_q, real_images, fake_images, input_images, alpha))

    assert jnp.allclose(loss, ref, rtol=2e-2, atol=2e-2), (loss, ref)
    print("KERNEL_OK")
</pallas_src>

<mosaic_0001>
module attributes {stable_mosaic.version = 11 : i64} {
  func.func @_gp_kernel(%arg0: i32, %arg1: i32, %arg2: memref<2x512xf32, #tpu.memory_space<vmem>>, %arg3: memref<2x512xf32, #tpu.memory_space<vmem>>, %arg4: memref<2x512xf32, #tpu.memory_space<vmem>>, %arg5: memref<2x1xf32, #tpu.memory_space<vmem>>, %arg6: memref<512x256xbf16, #tpu.memory_space<vmem>>, %arg7: memref<512x256xbf16, #tpu.memory_space<vmem>>, %arg8: memref<1x2x256xf32, #tpu.memory_space<vmem>>, %arg9: memref<1x256x256xf32, #tpu.memory_space<vmem>>) attributes {dimension_semantics = [#tpu.dimension_semantics<parallel>, #tpu.dimension_semantics<arbitrary>], iteration_bounds = array<i64: 2, 1>, scalar_prefetch = 0 : i64, scratch_operands = 0 : i64, tpu.core_type = #tpu.core_type<tc>, window_params = [{transform_indices = @transform_0, window_bounds = array<i64: 2, 512>}, {transform_indices = @transform_1, window_bounds = array<i64: 2, 512>}, {transform_indices = @transform_2, window_bounds = array<i64: 2, 512>}, {pipeline_mode = #tpu.pipeline_mode<synchronous>, transform_indices = @transform_3, window_bounds = array<i64: 2, 1>}, {transform_indices = @transform_4, window_bounds = array<i64: 512, 256>}, {transform_indices = @transform_5, window_bounds = array<i64: 512, 256>}, {transform_indices = @transform_6, window_bounds = array<i64: 1, 2, 256>}, {transform_indices = @transform_7, window_bounds = array<i64: 1, 256, 256>}]} {
    %c0_i32 = arith.constant 0 : i32
    %0 = arith.cmpi eq, %arg1, %c0_i32 : i32
    %1 = arith.extui %0 : i1 to i32
    %c0_i32_0 = arith.constant 0 : i32
    %2 = arith.cmpi ne, %1, %c0_i32_0 : i32
    scf.if %2 {
      %cst_26 = arith.constant 0.000000e+00 : f32
      %31 = vector.broadcast %cst_26 : f32 to vector<2x256xf32>
      %c0_27 = arith.constant 0 : index
      %c0_28 = arith.constant 0 : index
      %c0_29 = arith.constant 0 : index
      %32 = vector.load %arg8[%c0_27, %c0_28, %c0_29] : memref<1x2x256xf32, #tpu.memory_space<vmem>>, vector<1x2x256xf32>
      %33 = vector.shape_cast %32 : vector<1x2x256xf32> to vector<2x256xf32>
      %34 = vector.shape_cast %31 : vector<2x256xf32> to vector<1x2x256xf32>
      tpu.vector_store %arg8[%c0_27, %c0_28, %c0_29], %34 {strides = array<i32>} : memref<1x2x256xf32, #tpu.memory_space<vmem>>, vector<1x2x256xf32>,
      %cst_30 = arith.constant 0.000000e+00 : f32
      %35 = vector.broadcast %cst_30 : f32 to vector<256x256xf32>
      %c0_31 = arith.constant 0 : index
      %c0_32 = arith.constant 0 : index
      %c0_33 = arith.constant 0 : index
      %36 = vector.load %arg9[%c0_31, %c0_32, %c0_33] : memref<1x256x256xf32, #tpu.memory_space<vmem>>, vector<1x256x256xf32>
      %37 = vector.shape_cast %36 : vector<1x256x256xf32> to vector<256x256xf32>
      %38 = vector.shape_cast %35 : vector<256x256xf32> to vector<1x256x256xf32>
      tpu.vector_store %arg9[%c0_31, %c0_32, %c0_33], %38 {strides = array<i32>} : memref<1x256x256xf32, #tpu.memory_space<vmem>>, vector<1x256x256xf32>,
    } else {
    }
    %c0 = arith.constant 0 : index
    %c0_1 = arith.constant 0 : index
    %3 = vector.load %arg5[%c0, %c0_1] : memref<2x1xf32, #tpu.memory_space<vmem>>, vector<2x1xf32>
    %c0_2 = arith.constant 0 : index
    %c0_3 = arith.constant 0 : index
    %4 = vector.load %arg2[%c0_2, %c0_3] : memref<2x512xf32, #tpu.memory_space<vmem>>, vector<2x512xf32>
    %c0_4 = arith.constant 0 : index
    %c0_5 = arith.constant 0 : index
    %5 = vector.load %arg3[%c0_4, %c0_5] : memref<2x512xf32, #tpu.memory_space<vmem>>, vector<2x512xf32>
    %6 = arith.subf %4, %5 : vector<2x512xf32>
    %7 = vector.broadcast %3 : vector<2x1xf32> to vector<2x512xf32>
    %8 = arith.mulf %7, %6 : vector<2x512xf32>
    %9 = arith.addf %5, %8 : vector<2x512xf32>
    %c0_6 = arith.constant 0 : index
    %c0_7 = arith.constant 0 : index
    %10 = vector.load %arg6[%c0_6, %c0_7] : memref<512x256xbf16, #tpu.memory_space<vmem>>, vector<512x256xbf16>
    %c0_8 = arith.constant 0 : index
    %c0_9 = arith.constant 0 : index
    %11 = vector.load %arg7[%c0_8, %c0_9] : memref<512x256xbf16, #tpu.memory_space<vmem>>, vector<512x256xbf16>
    %c0_10 = arith.constant 0 : index
    %c0_11 = arith.constant 0 : index
    %12 = vector.load %arg4[%c0_10, %c0_11] : memref<2x512xf32, #tpu.memory_space<vmem>>, vector<2x512xf32>
    %13 = arith.truncf %12 : vector<2x512xf32> to vector<2x512xbf16>
    %14 = arith.truncf %9 : vector<2x512xf32> to vector<2x512xbf16>
    %c0_12 = arith.constant 0 : index
    %c0_13 = arith.constant 0 : index
    %c0_14 = arith.constant 0 : index
    %15 = vector.load %arg8[%c0_12, %c0_13, %c0_14] : memref<1x2x256xf32, #tpu.memory_space<vmem>>, vector<1x2x256xf32>
    %16 = vector.shape_cast %15 : vector<1x2x256xf32> to vector<2x256xf32>
    %cst = arith.constant dense<0.000000e+00> : vector<2x256xf32>
    %17 = tpu.matmul %13, %10, %cst {dimension_numbers = #tpu.dot_dimension_numbers<[1], [0], [0], [1], [0, 0, 1, 1], [], []>} : vector<2x512xbf16>, vector<512x256xbf16>, vector<2x256xf32> -> vector<2x256xf32>
    %cst_15 = arith.constant dense<0.000000e+00> : vector<2x256xf32>
    %18 = tpu.matmul %14, %11, %cst_15 {dimension_numbers = #tpu.dot_dimension_numbers<[1], [0], [0], [1], [0, 0, 1, 1], [], []>} : vector<2x512xbf16>, vector<512x256xbf16>, vector<2x256xf32> -> vector<2x256xf32>
    %19 = arith.addf %17, %18 : vector<2x256xf32>
    %20 = arith.addf %16, %19 : vector<2x256xf32>
    %c0_16 = arith.constant 0 : index
    %c0_17 = arith.constant 0 : index
    %c0_18 = arith.constant 0 : index
    %21 = vector.load %arg8[%c0_16, %c0_17, %c0_18] : memref<1x2x256xf32, #tpu.memory_space<vmem>>, vector<1x2x256xf32>
    %22 = vector.shape_cast %21 : vector<1x2x256xf32> to vector<2x256xf32>
    %23 = vector.shape_cast %20 : vector<2x256xf32> to vector<1x2x256xf32>
    tpu.vector_store %arg8[%c0_16, %c0_17, %c0_18], %23 {strides = array<i32>} : memref<1x2x256xf32, #tpu.memory_space<vmem>>, vector<1x2x256xf32>,
    %c0_19 = arith.constant 0 : index
    %c0_20 = arith.constant 0 : index
    %c0_21 = arith.constant 0 : index
    %24 = vector.load %arg9[%c0_19, %c0_20, %c0_21] : memref<1x256x256xf32, #tpu.memory_space<vmem>>, vector<1x256x256xf32>
    %25 = vector.shape_cast %24 : vector<1x256x256xf32> to vector<256x256xf32>
    %cst_22 = arith.constant dense<0.000000e+00> : vector<256x256xf32>
    %26 = tpu.matmul %11, %11, %cst_22 {dimension_numbers = #tpu.dot_dimension_numbers<[0], [0], [1], [1], [0, 1, 1, 1], [], []>} : vector<512x256xbf16>, vector<512x256xbf16>, vector<256x256xf32> -> vector<256x256xf32>
    %27 = arith.addf %25, %26 : vector<256x256xf32>
    %c0_23 = arith.constant 0 : index
    %c0_24 = arith.constant 0 : index
    %c0_25 = arith.constant 0 : index
    %28 = vector.load %arg9[%c0_23, %c0_24, %c0_25] : memref<1x256x256xf32, #tpu.memory_space<vmem>>, vector<1x256x256xf32>
    %29 = vector.shape_cast %28 : vector<1x256x256xf32> to vector<256x256xf32>
    %30 = vector.shape_cast %27 : vector<256x256xf32> to vector<1x256x256xf32>
    tpu.vector_store %arg9[%c0_23, %c0_24, %c0_25], %30 {strides = array<i32>} : memref<1x256x256xf32, #tpu.memory_space<vmem>>, vector<1x256x256xf32>,
    return
  }
  func.func @transform_0(%arg0: i32, %arg1: i32) -> (i32, i32) {
    %c1_i32 = arith.constant 1 : i32
    %0 = arith.muli %arg0, %c1_i32 : i32
    %1 = arith.addi %0, %arg1 : i32
    %c0_i32 = arith.constant 0 : i32
    %c0_i32_0 = arith.constant 0 : i32
    return %c0_i32, %1 : i32, i32
  }
  func.func @transform_1(%arg0: i32, %arg1: i32) -> (i32, i32) {
    %c1_i32 = arith.constant 1 : i32
    %0 = arith.muli %arg0, %c1_i32 : i32
    %1 = arith.addi %0, %arg1 : i32
    %c0_i32 = arith.constant 0 : i32
    %c0_i32_0 = arith.constant 0 : i32
    return %c0_i32, %1 : i32, i32
  }
  func.func @transform_2(%arg0: i32, %arg1: i32) -> (i32, i32) {
    %c1_i32 = arith.constant 1 : i32
    %0 = arith.muli %arg0, %c1_i32 : i32
    %1 = arith.addi %0, %arg1 : i32
    %c0_i32 = arith.constant 0 : i32
    %c0_i32_0 = arith.constant 0 : i32
    return %c0_i32, %1 : i32, i32
  }
  func.func @transform_3(%arg0: i32, %arg1: i32) -> (i32, i32) {
    %c0_i32 = arith.constant 0 : i32
    %c0_i32_0 = arith.constant 0 : i32
    %c0_i32_1 = arith.constant 0 : i32
    return %c0_i32, %c0_i32_0 : i32, i32
  }
  func.func @transform_4(%arg0: i32, %arg1: i32) -> (i32, i32) {
    %c1_i32 = arith.constant 1 : i32
    %0 = arith.muli %arg0, %c1_i32 : i32
    %1 = arith.addi %0, %arg1 : i32
    %c0_i32 = arith.constant 0 : i32
    %c0_i32_0 = arith.constant 0 : i32
    return %1, %c0_i32 : i32, i32
  }
  func.func @transform_5(%arg0: i32, %arg1: i32) -> (i32, i32) {
    %c1_i32 = arith.constant 1 : i32
    %0 = arith.muli %arg0, %c1_i32 : i32
    %1 = arith.addi %0, %arg1 : i32
    %c0_i32 = arith.constant 0 : i32
    %c0_i32_0 = arith.constant 0 : i32
    return %1, %c0_i32 : i32, i32
  }
  func.func @transform_6(%arg0: i32, %arg1: i32) -> (i32, i32, i32) {
    %c0_i32 = arith.constant 0 : i32
    %c0_i32_0 = arith.constant 0 : i32
    %c0_i32_1 = arith.constant 0 : i32
    return %arg0, %c0_i32, %c0_i32_0 : i32, i32, i32
  }
  func.func @transform_7(%arg0: i32, %arg1: i32) -> (i32, i32, i32) {
    %c0_i32 = arith.constant 0 : i32
    %c0_i32_0 = arith.constant 0 : i32
    %c0_i32_1 = arith.constant 0 : i32
    return %arg0, %c0_i32, %c0_i32_0 : i32, i32, i32
  }
}

</mosaic_0001>

<bundles_post_ra>
// kernel: tpu_custom_call.1
= control target key start
LH: loop header
LB: loop body
LE: loop exit
PB: predicated region body
PF: predicated region fallthrough
CT: control target
= control target key end

     0   :  { %s5482_s0 = inlined_call_operand.hbm [shape: f32[2,1024], index: 0, kind: input, shape index: {}]   ;;  %s5483_s1 = inlined_call_operand.hbm [shape: f32[2,1024], index: 1, kind: input, shape index: {}]   ;;  %s5484_s2 = inlined_call_operand.hbm [shape: f32[2,1024], index: 2, kind: input, shape index: {}]   ;;  %s5485_s3 = inlined_call_operand.vmem [shape: f32[2,1], index: 3, kind: input, shape index: {}]   ;;  %s5486_s4 = inlined_call_operand.hbm [shape: bf16[1024,256], index: 4, kind: input, shape index: {}]   ;;  %s5487_s5 = inlined_call_operand.hbm [shape: bf16[1024,256], index: 5, kind: input, shape index: {}]   ;;  %s5488_s6 = inlined_call_operand.hbm [shape: f32[2,2,256], index: 6, kind: output, shape index: {0}]   ;;  %s5489_s7 = inlined_call_operand.hbm [shape: f32[2,256,256], index: 7, kind: output, shape index: {1}]  }
   0x1   :  { %5575 = sst [smem:[#allocation68_spill]] %s5483_s1 }
   0x2   :  { %5576 = sst [smem:[#allocation69_spill]] %s5486_s4 }
   0x3   :  { %5577 = sst [smem:[#allocation70_spill]] %s5487_s5 }
   0x4   :  { %5578 = sst [smem:[#allocation71_spill]] %s5488_s6 }
   0x5   :  { %5579 = sst [smem:[#allocation72_spill]] %s5489_s7 }
   0x6   :  { %13 = vsyncpa [#allocation3], 0 }
   0x7   :  { %15 = vsyncpa [#allocation3 + $0x1], 0 }
   0x8   :  { %16 = vsyncpa [#allocation6], 0 }
   0x9   :  { %18 = vsyncpa [#allocation6 + $0x1], 0 }
   0xa   :  { %19 = vsyncpa [#allocation9], 0 }
   0xb   :  { %21 = vsyncpa [#allocation9 + $0x1], 0 }
   0xc   :  { %22 = vsyncpa [#allocation4], 0 }
   0xd   :  { %24 = vsyncpa [#allocation4 + $0x1], 0 }
   0xe   :  { %25 = vsyncpa [#allocation13], 0 }
   0xf   :  { %27 = vsyncpa [#allocation13 + $0x1], 0  ;;  %s3966_s24 = smov 0   ;;  %s3968_s25 = smov 0  }
  0x10   :  { %s3970_s26 = smov 0   ;;  %s3972_s27 = smov 0  }
  0x11   :  { %s3974_s28 = smov 0   ;;  %s3976_s29 = smov 0  }
  0x12 LB: > { %5580 = sst [smem:[#allocation19_spill]] %s3898_s24  ;;  %s3997_s30 = sadd.s32 4294967295, %s3918_s29   ;;  %s3918_s29 = sphi %s3976_s29, %s33_s29   ;;  %s3914_s28 = sphi %s3974_s28, %s5751_s28   ;;  %s3910_s27 = sphi %s3972_s27, %s5750_s27   ;;  %s3906_s26 = sphi %s3970_s26, %s5749_s26   ;;  %s3902_s25 = sphi %s3968_s25, %s5753_s25   ;;  %s3898_s24 = sphi %s3966_s24, %s5752_s24  }
  0x13   : > { %5581 = sst [smem:[#allocation20_spill]] %s3906_s26  ;;  %s2867_s8 = sadd.s32 4294967294, %s3918_s29  }
  0x14   : > { %5582 = sst [smem:[#allocation21_spill]] %s3914_s28  ;;  %s45_s9 = sadd.s32 1, %s3914_s28 }
  0x15   : > { %5583 = sst [smem:[#allocation22_spill]] %s3918_s29  ;;  %s54_s10 = sadd.s32 1, %s3906_s26 }
  0x16   : > { %p47_p0 = scmp.ge.s32.totalorder %s45_s9, 2  ;;  %p61_p1 = scmp.ne.s32.totalorder %s3906_s26, %s3902_s25 }
  0x17   : > { %p62_p2 = scmp.eq.s32.totalorder %s3918_s29, 0  ;;  %p67_p3 = scmp.ne.s32.totalorder %s3902_s25, %s3898_s24 }
  0x18   : > { %s5755_s9 = smov (%p47_p0, %s45_s9), 0  ;;  %p68_p5 = scmp.eq.s32.totalorder %s3997_s30, 0 }
  0x19   : > { %5584 = sst [smem:[#allocation23_spill]] %s5755_s9  ;;  %p4009_p4 = por %p62_p2, %p61_p1 }
  0x1a   : > { %s51_s12 = ssub.s32 %s3914_s28, %s5755_s9  ;;  %p224_p6 = scmp.eq.s32.totalorder %s3997_s30, 1 }
  0x1b   : > { %p52_p7 = scmp.eq.s32.totalorder %s51_s12, 0  ;;  %p4017_p8 = por %p68_p5, %p67_p3 }
  0x1c   : > { %p4021_p9 = por %p224_p6, %p61_p1  ;;  %p230_p10 = scmp.eq.s32.totalorder %s2867_s8, 1 }
  0x1d   : > { %s4026_s15 = scalar_select %p52_p7, %s3906_s26, %s54_s10  }
  0x1e   : > { %s5587_s14 = scalar_select %p4021_p9, 1, 0 }
  0x1f   : > { %5589 = sst [smem:[#allocation25_spill]] %s4026_s15  ;;  %p4028_p11 = por %p230_p10, %p67_p3 }
  0x20   : > { %5588 = sst [smem:[#allocation24_spill]] %s5587_s14  ;;  %p2869_p12 = scmp.ge.s32.totalorder %s3918_s29, 2 }
  0x21   : > { %s5590_s16 = scalar_select %p4028_p11, 1, 0 }
  0x22   : > { %p3589_p13 = scmp.lt.s32.totalorder %s3918_s29, 2  ;;  %s4035_s17 = sand.u32 1, %s3906_s26  }
  0x23   : > { %5591 = sst [smem:[#allocation26_spill]] %s5590_s16  ;;  %s4038_s18 = sshll.u32 %s4035_s17, 3 }
  0x24   : > { %s4041_s19 = sshll.u32 %s3914_s28, 3  ;;  %p4045_p0 = pnand %p3589_p13, %p4009_p4 }
  0x25   : > { %s300_s21 = sand.u32 1, %s3918_s29   ;;  %s5593_s1 = sld [smem:[#allocation68_spill]] }
  0x26   : > { %s304_s12 = scalar_lea.vmem [#allocation5], %s4038_s18  ;;  %s4055_s15 = scalar_lea.sflag [#allocation6], %s300_s21 }
  0x27   : > { %s314_s9 = sshll.u32 %s304_s12, 4  ;;  %p2887_p1 = scmp.ge.s32.totalorder %s3918_s29, 1  ;;  %s315_s9 = int_to_ptr.vmem [resolvable:$true] %s314_s9 }
  0x28   : > { %p388_p2 = scmp.lt.s32.totalorder %s3918_s29, 3  ;;  %s2879_s11 = sshll.u32 %s4035_s17, 9 }
  0x29   : > { %s3419_s26 = sshll.u32 %s3914_s28, 9  ;;  %s5595_s4 = sld [smem:[#allocation69_spill]] }
  0x2a   : > { %p4064_p3 = pnand %p2887_p1, %p388_p2  ;;  %s3921_s28 = smov 8  }
  0x2b   : > { %s310_s8 = scalar_lea.hbm %s5593_s1, %s4041_s19  ;;  %s346_s1 = scalar_lea.vmem [#allocation8], %s2879_s11 }
  0x2c   : > { %s312_s10 = sshll.u32 %s310_s8, 4  ;;  %s356_s24 = sshll.u32 %s346_s1, 4  ;;  %s313_s10 = int_to_ptr.hbm [resolvable:$true] %s312_s10  ;;  %s357_s24 = int_to_ptr.vmem [resolvable:$true] %s356_s24 }
  0x2d   : > { %3572 = dma.hbm_to_vmem [thread:$0]  (!%p4045_p0), %s313_s10, 128, %s315_s9, %s4055_s15  }
  0x2e   : > { %s4071_s9 = scalar_lea.sflag [#allocation9], %s300_s21  ;;  %s3920_s10 = smov 128  }
  0x2f   : > { %s353_s8 = scalar_lea.hbm %s5595_s4, %s3419_s26  ;;  %s5596_s5 = sld [smem:[#allocation70_spill]] }
  0x30   : > { %s354_s12 = sshll.u32 %s353_s8, 4  ;;  %s370_s4 = scalar_lea.vmem [#allocation10], %s2879_s11  ;;  %s355_s12 = int_to_ptr.hbm [resolvable:$true] %s354_s12 }
  0x31   : > { %3578 = dma.hbm_to_vmem [thread:$0]  (!%p4045_p0), %s355_s12, 8192, %s357_s24, %s4071_s9, %s3920_s10, %s3920_s10, %s3921_s28  }
  0x32   : > { %s380_s1 = sshll.u32 %s370_s4, 4  ;;  %s289_s6 = scalar_lea.hbm %s5482_s0, %s4041_s19  ;;  %s381_s1 = int_to_ptr.vmem [resolvable:$true] %s380_s1 }
  0x33   : > { %s283_s14 = scalar_lea.vmem [#allocation2], %s4038_s18  ;;  %s291_s12 = sshll.u32 %s289_s6, 4  ;;  %s292_s12 = int_to_ptr.hbm [resolvable:$true] %s291_s12 }
  0x34   : > { %s293_s24 = sshll.u32 %s283_s14, 4  ;;  %s280_s29 = scalar_lea.sflag [#allocation3], %s4035_s17  ;;  %s294_s24 = int_to_ptr.vmem [resolvable:$true] %s293_s24 }
  0x35   : > { %s377_s23 = scalar_lea.hbm %s5596_s5, %s3419_s26  ;;  %s331_s11 = scalar_lea.hbm %s5484_s2, %s4041_s19 }
  0x36   : > { %s378_s8 = sshll.u32 %s377_s23, 4  ;;  %s325_s22 = scalar_lea.vmem [#allocation7], %s4038_s18  ;;  %s379_s8 = int_to_ptr.hbm [resolvable:$true] %s378_s8 }
  0x37   : > { %3569 = dma.hbm_to_vmem [thread:$0]  (!%p4045_p0), %s292_s12, 128, %s294_s24, %s280_s29  }
  0x38   : > { %s335_s23 = sshll.u32 %s325_s22, 4  ;;  %s333_s5 = sshll.u32 %s331_s11, 4  ;;  %s336_s23 = int_to_ptr.vmem [resolvable:$true] %s335_s23  ;;  %s334_s5 = int_to_ptr.hbm [resolvable:$true] %s333_s5 }
  0x39   : > { %3575 = dma.hbm_to_vmem [thread:$0]  (!%p4045_p0), %s334_s5, 128, %s336_s23, %s4055_s15  }
  0x3a   : > { %3581 = dma.hbm_to_vmem [thread:$0]  (!%p4045_p0), %s379_s8, 8192, %s381_s1, %s4071_s9, %s3920_s10, %s3920_s10, %s3921_s28  }
  0x3b   : > { %392 = sbr.rel (%p4064_p3) target bundleno = 1026 (0x402), region = 44 }
  0x40   : > { %s4101_s6 = sand.u32 1, %s3902_s25  }
  0x41   : > { %s4104_s7 = sshll.u32 %s4101_s6, 3  ;;  %s395_s14 = scalar_lea.sflag [#allocation3], %s4101_s6 }
  0x42   : > { %s398_s17 = scalar_lea.vmem [#allocation2], %s4104_s7 }
  0x43   : > { %3877 = dma.done.wait (%p4017_p8), %s395_s14, 128  }
  0x44   : > { %3879 = vsyncadd (%p4017_p8), %s395_s14, 4294967168  ;;  %s404_s5 = sand.u32 1, %s3997_s30   ;;  %s408_s15 = scalar_lea.vmem [#allocation5], %s4104_s7 }
  0x45   : > { %s405_s28 = scalar_lea.sflag [#allocation6], %s404_s5 }
  0x46   : > { %3881 = dma.done.wait (%p4017_p8), %s405_s28, 256  }
  0x47   : > { %3883 = vsyncadd (%p4017_p8), %s405_s28, 4294967040  ;;  %s4119_s16 = sshll.u32 %s4101_s6, 9  ;;  %s418_s18 = scalar_lea.vmem [#allocation7], %s4104_s7 }
  0x48   : > { %s425_s19 = scalar_lea.sflag [#allocation9], %s404_s5  ;;  %s4123_s20 = scalar_lea.vmem [#allocation8], %s4119_s16 }
  0x49   : > { %3885 = dma.done.wait (%p4017_p8), %s425_s19, 16384  }
  0x4a   : > { %3887 = vsyncadd (%p4017_p8), %s425_s19, 4294950912  ;;  %v3922_v0 = vmov 0   ;;  %v574_v1 = vld [vmem:[%s5485_s3] sm:$0x3]  ;;  %s4133_s10 = scalar_lea.vmem [#allocation10], %s4119_s16  ;;  %vm604_vm0 = vcmask 1041408  }
  0x4b   : > { %3645 = vset.pattern.permute.xlu0 %v3922_v0  ;;  %v3534_v2 = vld [vmem:[%s4133_s10 + $0x184] sm:$0xf]  ;;  %v3089_v3 = vld [vmem:[%s4133_s10 + $0x180] sm:$0xf]  ;;  %v3091_v4 = vld [vmem:[%s4133_s10 + $0x188] sm:$0xf0] }
  0x4c   : > { %580 = vperm.xlu0 %3645, %v574_v1   ;;  %v3535_v5 = vld [vmem:[%s4133_s10 + $0x184] sm:$0xf0]  ;;  %v4141_v7 = vor.u32 %v3534_v2, %v3091_v4  ;;  %v3536_v8 = vld [vmem:[%s4133_s10 + $0x194] sm:$0xf]  ;;  %v3097_v9 = vld [vmem:[%s4133_s10 + $0x190] sm:$0xf] }
  0x4d   : > { %v4139_v6 = vor.u32 %v3535_v5, %v3089_v3  ;;  %v3099_v10 = vld [vmem:[%s4133_s10 + $0x198] sm:$0xf0]  ;;  %v3537_v11 = vld [vmem:[%s4133_s10 + $0x194] sm:$0xf0]  ;;  %v3486_v14 = vld [vmem:[%s4133_s10 + $0x4] sm:$0xf] }
  0x4e   : > { %5598 = vst [vmem:[#allocation28_spill] sm:$0xff] %v4141_v7  ;;  %v4149_v12 = vor.u32 %v3537_v11, %v3097_v9  ;;  %v4151_v13 = vor.u32 %v3536_v8, %v3099_v10  ;;  %v2897_v15 = vld [vmem:[%s4133_s10] sm:$0xf]  ;;  %v2899_v16 = vld [vmem:[%s4133_s10 + $0x8] sm:$0xf0]  ;;  %vm606_vm1 = vcmask 1045508  }
  0x4f   : > { %5597 = vst [vmem:[#allocation27_spill] sm:$0xff] %v4139_v6  ;;  %1761 = vxpose.binary.xlu1.c.b16.start [1/16] %v4141_v7, %v4139_v6, 128  ;;  %v3487_v17 = vld [vmem:[%s4133_s10 + $0x4] sm:$0xf0]  ;;  %v4159_v18 = vor.u32 %v3486_v14, %v2899_v16  ;;  %v3538_v20 = vld [vmem:[%s4133_s10 + $0x1a4] sm:$0xf]  ;;  %vm608_vm2 = vcmask 1043456  }
  0x50   : > { %5599 = vst [vmem:[#allocation29_spill] sm:$0xff] %v4149_v12  ;;  %v4161_v19 = vor.u32 %v3487_v17, %v2897_v15  ;;  %v3518_v21 = vld [vmem:[%s4133_s10 + $0x104] sm:$0xf]  ;;  %v3025_v22 = vld [vmem:[%s4133_s10 + $0x100] sm:$0xf]  ;;  %s2893_s13 = sshll.u32 %s4101_s6, 2 }
  0x51   : > { %5600 = vst [vmem:[#allocation30_spill] sm:$0xff] %v4151_v13  ;;  %v3027_v23 = vld [vmem:[%s4133_s10 + $0x108] sm:$0xf0]  ;;  %v3519_v24 = vld [vmem:[%s4133_s10 + $0x104] sm:$0xf0]  ;;  %s4874_s8 = scalar_lea.vmem [#allocation11], %s2893_s13 }
  0x52   : > { %5601 = vst [vmem:[#allocation31_spill] sm:$0xff] %v4159_v18  ;;  %1689 = vxpose.binary.xlu2.c.b16.start [1/16] %v4159_v18, %v4161_v19, 128  ;;  %v3105_v25 = vld [vmem:[%s4133_s10 + $0x1a0] sm:$0xf]  ;;  %v3107_v26 = vld [vmem:[%s4133_s10 + $0x1a8] sm:$0xf0]  ;;  %v4173_v28 = vor.u32 %v3519_v24, %v3025_v22  ;;  %v4175_v29 = vor.u32 %v3518_v21, %v3027_v23  ;;  %s5013_s1 = scalar_lea.vmem [#allocation12], %s4119_s16 }
  0x53   : > { %5602 = vst [vmem:[#allocation32_spill] sm:$0xff] %v4161_v19  ;;  %v3539_v27 = vld [vmem:[%s4133_s10 + $0x1a4] sm:$0xf0]  ;;  %v4179_v31 = vor.u32 %v3538_v20, %v3107_v26  ;;  %v2953_v32 = vld [vmem:[%s4133_s10 + $0x70] sm:$0xf]  ;;  %s3550_s21 = sshll.u32 %s3910_s27, 2 }
  0x54   : > { %5603 = vst [vmem:[#allocation33_spill] sm:$0xff] %v4173_v28  ;;  %v4177_v30 = vor.u32 %v3539_v27, %v3105_v25  ;;  %v3501_v33 = vld [vmem:[%s4133_s10 + $0x74] sm:$0xf0]  ;;  %v3081_v34 = vld [vmem:[%s4133_s10 + $0x170] sm:$0xf]  ;;  %s5742_s26 = sld [smem:[#allocation71_spill]] }
  0x55   : > { %5604 = vst [vmem:[#allocation34_spill] sm:$0xff] %v4175_v29  ;;  %v4188_v35 = vor.u32 %v3501_v33, %v2953_v32  ;;  %v3533_v36 = vld [vmem:[%s4133_s10 + $0x174] sm:$0xf0]  ;;  %v3145_v37 = vld [vmem:[%s4133_s10 + $0x1f0] sm:$0xf]  ;;  %s2644_s22 = sshll.u32 %s4874_s8, 4  ;;  %s2645_s22 = int_to_ptr.vmem [resolvable:$true] %s2644_s22 }
  0x56   : > { %5605 = vst [vmem:[#allocation35_spill] sm:$0xff] %v4179_v31  ;;  %v3549_v38 = vld [vmem:[%s4133_s10 + $0x1f4] sm:$0xf0]  ;;  %v4193_v39 = vor.u32 %v3533_v36, %v3081_v34  ;;  %v3488_v41 = vld [vmem:[%s4133_s10 + $0x14] sm:$0xf]  ;;  %s2626_s7 = scalar_lea.sflag [#allocation4], %s4101_s6 }
  0x57   : > { %v4195_v40 = vor.u32 %v3549_v38, %v3145_v37  ;;  %v2905_v42 = vld [vmem:[%s4133_s10 + $0x10] sm:$0xf]  ;;  %v2907_v43 = vld [vmem:[%s4133_s10 + $0x18] sm:$0xf0]  ;;  %1090 = vmatpush.bf16.msra.mxu0 %v4188_v35  ;;  %v3489_v44 = vld [vmem:[%s4133_s10 + $0x14] sm:$0xf0] }
  0x58   : > { %v4202_v45 = vor.u32 %v3488_v41, %v2907_v43  ;;  %v2945_v46 = vld [vmem:[%s4133_s10 + $0x60] sm:$0xf]  ;;  %v3499_v47 = vld [vmem:[%s4133_s10 + $0x64] sm:$0xf0]  ;;  %1116 = vmatpush.bf16.msra.mxu2 %v4193_v39  ;;  %v4208_v48 = vor.u32 %v3489_v44, %v2905_v42  ;;  %v3540_v56 = vld [vmem:[%s4133_s10 + $0x1b4] sm:$0xf] }
  0x59   : > { %1129 = vmatpush.bf16.msra.mxu3 %v4195_v40  ;;  %v4210_v49 = vor.u32 %v3499_v47, %v2945_v46  ;;  %v3073_v50 = vld [vmem:[%s4133_s10 + $0x160] sm:$0xf]  ;;  %v3531_v51 = vld [vmem:[%s4133_s10 + $0x164] sm:$0xf0]  ;;  %v3520_v57 = vld [vmem:[%s4133_s10 + $0x114] sm:$0xf] }
  0x5a   : > { %5606 = vst [vmem:[#allocation36_spill] sm:$0xff] %v4202_v45  ;;  %v3137_v52 = vld [vmem:[%s4133_s10 + $0x1e0] sm:$0xf]  ;;  %v4215_v53 = vor.u32 %v3531_v51, %v3073_v50  ;;  %v3547_v54 = vld [vmem:[%s4133_s10 + $0x1e4] sm:$0xf0]  ;;  %s5743_s4 = smov %s5742_s26  ;;  %s2642_s11 = scalar_lea.hbm %s5742_s26, %s3550_s21 }
  0x5b   : > { %v4220_v55 = vor.u32 %v3547_v54, %v3137_v52  ;;  %1091 = vmatpush.bf16.msra.mxu0 %v4210_v49  ;;  %v3129_v58 = vld [vmem:[%s4133_s10 + $0x1d0] sm:$0xf]  ;;  %v3545_v59 = vld [vmem:[%s4133_s10 + $0x1d4] sm:$0xf0]  ;;  %v3035_v61 = vld [vmem:[%s4133_s10 + $0x118] sm:$0xf0] }
  0x5c   : > { %v3033_v60 = vld [vmem:[%s4133_s10 + $0x110] sm:$0xf]  ;;  %v3521_v62 = vld [vmem:[%s4133_s10 + $0x114] sm:$0xf0]  ;;  %1117 = vmatpush.bf16.msra.mxu2 %v4215_v53  ;;  %v4232_v63 = vor.u32 %v3545_v59, %v3129_v58  ;;  %v3115_v1 = vld [vmem:[%s4133_s10 + $0x1b8] sm:$0xf0]  ;;  %v4239_v4 = vor.u32 %v3520_v57, %v3035_v61 }
  0x5d   : > { %1130 = vmatpush.bf16.msra.mxu3 %v4220_v55  ;;  %v3113_v0 = vld [vmem:[%s4133_s10 + $0x1b0] sm:$0xf]  ;;  %v3541_v2 = vld [vmem:[%s4133_s10 + $0x1b4] sm:$0xf0]  ;;  %v4237_v3 = vor.u32 %v3521_v62, %v3033_v60  ;;  %v4243_v8 = vor.u32 %v3540_v56, %v3115_v1  ;;  %v3121_v9 = vld [vmem:[%s4133_s10 + $0x1c0] sm:$0xf] }
  0x5e   : > { %5608 = vst [vmem:[#allocation38_spill] sm:$0xff] %v4239_v4  ;;  %v4241_v5 = vor.u32 %v3541_v2, %v3113_v0  ;;  %v3543_v10 = vld [vmem:[%s4133_s10 + $0x1c4] sm:$0xf0]  ;;  %v2937_v11 = vld [vmem:[%s4133_s10 + $0x50] sm:$0xf]  ;;  %s2646_s23 = sshll.u32 %s2642_s11, 4  ;;  %s2647_s23 = int_to_ptr.hbm [resolvable:$true] %s2646_s23 }
  0x5f   : > { %1762 = vxpose.binary.xlu1.c.b16.cont [2/16] %v4151_v13, %v4149_v12, 128  ;;  %5607 = vst [vmem:[#allocation37_spill] sm:$0xff] %v4237_v3  ;;  %v3497_v14 = vld [vmem:[%s4133_s10 + $0x54] sm:$0xf0]  ;;  %v3065_v15 = vld [vmem:[%s4133_s10 + $0x150] sm:$0xf]  ;;  %v4253_v16 = vor.u32 %v3543_v10, %v3121_v9  ;;  %s3810_s14 = sshra.s32 %s2647_s23, 4  ;;  %s3811_s14 = int_to_ptr.hbm [resolvable:$true] %s3810_s14 }
  0x60   : > { %5609 = vst [vmem:[#allocation39_spill] sm:$0xff] %v4243_v8  ;;  %v4255_v17 = vor.u32 %v3497_v14, %v2937_v11  ;;  %v3529_v20 = vld [vmem:[%s4133_s10 + $0x154] sm:$0xf0]  ;;  %v2929_v22 = vld [vmem:[%s4133_s10 + $0x40] sm:$0xf]  ;;  %p3817_p7 = scmp.lt.s32.totalorder %s3811_s14, %s5743_s4 }
  0x61   : > { %1131 = vmatpush.bf16.msra.mxu3 %v4232_v63  ;;  %v4260_v21 = vor.u32 %v3529_v20, %v3065_v15  ;;  %v3495_v23 = vld [vmem:[%s4133_s10 + $0x44] sm:$0xf0]  ;;  %v3057_v24 = vld [vmem:[%s4133_s10 + $0x140] sm:$0xf]  ;;  %v2921_v27 = vld [vmem:[%s4133_s10 + $0x30] sm:$0xf] }
  0x62   : > { %1690 = vxpose.binary.xlu2.c.b16.cont [2/16] %v4202_v45, %v4208_v48, 128  ;;  %v4266_v25 = vor.u32 %v3495_v23, %v2929_v22  ;;  %v3527_v26 = vld [vmem:[%s4133_s10 + $0x144] sm:$0xf0]  ;;  %v3493_v32 = vld [vmem:[%s4133_s10 + $0x34] sm:$0xf0]  ;;  %v3049_v34 = vld [vmem:[%s4133_s10 + $0x130] sm:$0xf] }
  0x63   : > { %1092 = vmatpush.bf16.msra.mxu0 %v4255_v17  ;;  %1118 = vmatpush.bf16.msra.mxu2 %v4260_v21  ;;  %v4273_v33 = vor.u32 %v3527_v26, %v3057_v24  ;;  %v3525_v36 = vld [vmem:[%s4133_s10 + $0x134] sm:$0xf0]  ;;  %v3490_v37 = vld [vmem:[%s4133_s10 + $0x24] sm:$0xf]  ;;  %v2913_v38 = vld [vmem:[%s4133_s10 + $0x20] sm:$0xf]  ;;  %v4288_v50 = vor.u32 %v3493_v32, %v2921_v27 }
  0x64   : > { %v2915_v41 = vld [vmem:[%s4133_s10 + $0x28] sm:$0xf0]  ;;  %v3491_v42 = vld [vmem:[%s4133_s10 + $0x24] sm:$0xf0]  ;;  %v3017_v46 = vld [vmem:[%s4133_s10 + $0xf0] sm:$0xf]  ;;  %v4294_v52 = vor.u32 %v3525_v36, %v3049_v34 }
  0x65   : > { %1132 = vmatpush.bf16.msra.mxu3 %v4253_v16  ;;  %v4281_v43 = vor.u32 %v3491_v42, %v2913_v38  ;;  %v4283_v44 = vor.u32 %v3490_v37, %v2915_v41  ;;  %v3517_v47 = vld [vmem:[%s4133_s10 + $0xf4] sm:$0xf0]  ;;  %v3522_v54 = vld [vmem:[%s4133_s10 + $0x124] sm:$0xf]  ;;  %v3041_v56 = vld [vmem:[%s4133_s10 + $0x120] sm:$0xf] }
  0x66   : > { %v4291_v51 = vor.u32 %v3517_v47, %v3017_v46  ;;  %v3043_v57 = vld [vmem:[%s4133_s10 + $0x128] sm:$0xf0]  ;;  %v3523_v58 = vld [vmem:[%s4133_s10 + $0x124] sm:$0xf0]  ;;  %v3542_v59 = vld [vmem:[%s4133_s10 + $0x1c4] sm:$0xf] }
  0x67   : > { %5610 = vst [vmem:[#allocation40_spill] sm:$0xff] %v4283_v44  ;;  %1093 = vmatpush.bf16.msra.mxu0 %v4266_v25  ;;  %1119 = vmatpush.bf16.msra.mxu2 %v4273_v33  ;;  %v3123_v60 = vld [vmem:[%s4133_s10 + $0x1c8] sm:$0xf0]  ;;  %v4308_v61 = vor.u32 %v3523_v58, %v3041_v56  ;;  %v4310_v62 = vor.u32 %v3522_v54, %v3043_v57  ;;  %v3009_v1 = vld [vmem:[%s4133_s10 + $0xe0] sm:$0xf] }
  0x68   : > { %1103 = vmatpush.bf16.msra.mxu1 %v4291_v51  ;;  %v4312_v0 = vor.u32 %v3542_v59, %v3123_v60  ;;  %v3515_v2 = vld [vmem:[%s4133_s10 + $0xe4] sm:$0xf0]  ;;  %v3001_v10 = vld [vmem:[%s4133_s10 + $0xd0] sm:$0xf]  ;;  %v3513_v11 = vld [vmem:[%s4133_s10 + $0xd4] sm:$0xf0] }
  0x69   : > { %1133 = vmatpush.bf16.msra.mxu3 %v4241_v5  ;;  %5611 = vst [vmem:[#allocation41_spill] sm:$0xff] %v4310_v62  ;;  %v4323_v9 = vor.u32 %v3515_v2, %v3009_v1  ;;  %v3500_v14 = vld [vmem:[%s4133_s10 + $0x74] sm:$0xf]  ;;  %v2955_v15 = vld [vmem:[%s4133_s10 + $0x78] sm:$0xf0]  ;;  %v4337_v26 = vor.u32 %v3513_v11, %v3001_v10 }
  0x6a   : > { %5612 = vst [vmem:[#allocation42_spill] sm:$0xff] %v4312_v0  ;;  %v3532_v20 = vld [vmem:[%s4133_s10 + $0x174] sm:$0xf]  ;;  %v3083_v22 = vld [vmem:[%s4133_s10 + $0x178] sm:$0xf0]  ;;  %v4342_v36 = vor.u32 %v3500_v14, %v2955_v15 }
  0x6b   : > { %1094 = vmatpush.bf16.msra.mxu0 %v4288_v50  ;;  %1120 = vmatpush.bf16.msra.mxu2 %v4294_v52  ;;  %v3546_v23 = vld [vmem:[%s4133_s10 + $0x1e4] sm:$0xf]  ;;  %v3139_v24 = vld [vmem:[%s4133_s10 + $0x1e8] sm:$0xf0]  ;;  %v3548_v27 = vld [vmem:[%s4133_s10 + $0x1f4] sm:$0xf]  ;;  %v4344_v37 = vor.u32 %v3532_v20, %v3083_v22 }
  0x6c   : > { %1104 = vmatpush.bf16.msra.mxu1 %v4323_v9  ;;  %v3147_v32 = vld [vmem:[%s4133_s10 + $0x1f8] sm:$0xf0]  ;;  %v2993_v34 = vld [vmem:[%s4133_s10 + $0xc0] sm:$0xf]  ;;  %v3511_v41 = vld [vmem:[%s4133_s10 + $0xc4] sm:$0xf0]  ;;  %v4366_v10 = vor.u32 %v3546_v23, %v3139_v24 }
  0x6d   : > { %1134 = vmatpush.bf16.msra.mxu3 %v4177_v30  ;;  %v4346_v38 = vor.u32 %v3548_v27, %v3147_v32  ;;  %v3498_v42 = vld [vmem:[%s4133_s10 + $0x64] sm:$0xf]  ;;  %v2947_v46 = vld [vmem:[%s4133_s10 + $0x68] sm:$0xf0]  ;;  %v3492_v56 = vld [vmem:[%s4133_s10 + $0x34] sm:$0xf]  ;;  %v4361_v60 = vor.u32 %v3511_v41, %v2993_v34 }
  0x6e   : > { %1737 = vxpose.binary.xlu0.c.b16.start [1/16] %v4175_v29, %v4173_v28, 128  ;;  %v3530_v47 = vld [vmem:[%s4133_s10 + $0x164] sm:$0xf]  ;;  %v3075_v54 = vld [vmem:[%s4133_s10 + $0x168] sm:$0xf0]  ;;  %v2923_v57 = vld [vmem:[%s4133_s10 + $0x38] sm:$0xf0]  ;;  %v4370_v11 = vor.u32 %v3498_v42, %v2947_v46 }
  0x6f   : > { %1763 = vxpose.binary.xlu1.c.b16.cont [3/16] %v4179_v31, %v4177_v30, 128  ;;  %5613 = vst [vmem:[#allocation43_spill] sm:$0xff] %v4346_v38  ;;  %v3544_v58 = vld [vmem:[%s4133_s10 + $0x1d4] sm:$0xf]  ;;  %v3131_v59 = vld [vmem:[%s4133_s10 + $0x1d8] sm:$0xf0]  ;;  %v4363_v1 = vor.u32 %v3492_v56, %v2923_v57  ;;  %v4372_v14 = vor.u32 %v3530_v47, %v3075_v54  ;;  %v4383_v24 = vld [vmem:[%s408_s15] sm:$0xff] }
  0x70   : > { %1095 = vmatpush.bf16.msra.mxu0 %v4281_v43  ;;  %1121 = vmatpush.bf16.msra.mxu2 %v4308_v61  ;;  %v3524_v2 = vld [vmem:[%s4133_s10 + $0x134] sm:$0xf]  ;;  %5615 = vst [vmem:[#allocation45_spill] sm:$0xff] %v4366_v10  ;;  %v2985_v15 = vld [vmem:[%s4133_s10 + $0xb0] sm:$0xf]  ;;  %v4394_v47 = vor.u32 %v3544_v58, %v3131_v59  ;;  %s3816_s15 = scalar_lea.hbm %s5743_s4, 8 }
  0x71   : > { %1135 = vmatpush.bf16.msra.mxu3 %v4149_v12  ;;  %1105 = vmatpush.bf16.msra.mxu1 %v4337_v26  ;;  %5614 = vst [vmem:[#allocation44_spill] sm:$0xff] %v4363_v1  ;;  %v3509_v20 = vld [vmem:[%s4133_s10 + $0xb4] sm:$0xf0]  ;;  %v3051_v22 = vld [vmem:[%s4133_s10 + $0x138] sm:$0xf0] }
  0x72   : > { %1691 = vxpose.binary.xlu2.c.b16.cont [3/16] %v4283_v44, %v4281_v43, 128  ;;  %5616 = vst [vmem:[#allocation46_spill] sm:$0xff] %v4370_v11  ;;  %v575_v23 = vld [vmem:[%s398_s17] sm:$0xff]  ;;  %v4389_v34 = vor.u32 %v3509_v20, %v2985_v15  ;;  %v4396_v54 = vor.u32 %v3524_v2, %v3051_v22  ;;  %v2977_v58 = vld [vmem:[%s4133_s10 + $0xa0] sm:$0xf]  ;;  %v3507_v59 = vld [vmem:[%s4133_s10 + $0xa4] sm:$0xf0] }
  0x73   : > { %5617 = vst [vmem:[#allocation47_spill] sm:$0xff] %v4372_v14  ;;  %v3496_v27 = vld [vmem:[%s4133_s10 + $0x54] sm:$0xf]  ;;  %v577_v32 = vsub.f32 %v575_v23, %v4383_v24  ;;  %v2939_v41 = vld [vmem:[%s4133_s10 + $0x58] sm:$0xf0]  ;;  %v4415_v22 = vor.u32 %v3507_v59, %v2977_v58  ;;  %s3812_s17 = scalar_lea.hbm %s3811_s14, 4 }
  0x74   : > { %1096 = vmatpush.bf16.msra.mxu0 %v4208_v48  ;;  %1122 = vmatpush.bf16.msra.mxu2 %v4237_v3  ;;  %v3528_v42 = vld [vmem:[%s4133_s10 + $0x154] sm:$0xf]  ;;  %v3067_v46 = vld [vmem:[%s4133_s10 + $0x158] sm:$0xf0]  ;;  %5618 = vst [vmem:[#allocation48_spill] sm:$0xff] %v4394_v47  ;;  %v4400_v56 = vor.u32 %v3496_v27, %v2939_v41  ;;  %p3813_p4 = scmp.ne.s32.totalorder %s3811_s14, %s3812_s17  ;;  %p3818_p8 = scmp.lt.s32.totalorder %s3816_s15, %s3812_s17 }
  0x75   : > { %1136 = vmatpush.bf16.msra.mxu3 %v4139_v6  ;;  %1106 = vmatpush.bf16.msra.mxu1 %v4361_v60  ;;  %5619 = vst [vmem:[#allocation49_spill] sm:$0xff] %v4396_v54  ;;  %v4402_v57 = vor.u32 %v3528_v42, %v3067_v46  ;;  %v3494_v2 = vld [vmem:[%s4133_s10 + $0x44] sm:$0xf]  ;;  %v3059_v20 = vld [vmem:[%s4133_s10 + $0x148] sm:$0xf0]  ;;  %v740_v27 = vld [vmem:[%s418_s18] sm:$0xff] }
  0x76   : > { %584 = vst [vmem:[#allocation1] ss:$4 sm:$0xff] %v577_v32  ;;  %v3526_v15 = vld [vmem:[%s4133_s10 + $0x144] sm:$0xf]  ;;  %v2931_v23 = vld [vmem:[%s4133_s10 + $0x48] sm:$0xf0]  ;;  %p3814_p5 = pnand %p3813_p4, %p4021_p9  ;;  %p3819_p10 = por %p3818_p8, %p3817_p7 }
  0x77   : > { %5620 = vst [vmem:[#allocation50_spill] sm:$0xff] %v4400_v56  ;;  %v4422_v32 = vor.u32 %v3494_v2, %v2931_v23  ;;  %v4426_v46 = vor.u32 %v3526_v15, %v3059_v20  ;;  %v3505_v6 = vld [vmem:[%s4133_s10 + $0x94] sm:$0xf0]  ;;  %v2961_v15 = vld [vmem:[%s4133_s10 + $0x80] sm:$0xf] }
  0x78   : > { %1097 = vmatpush.bf16.msra.mxu0 %v4161_v19  ;;  %1123 = vmatpush.bf16.msra.mxu2 %v4173_v28  ;;  %5621 = vst [vmem:[#allocation51_spill] sm:$0xff] %v4402_v57  ;;  %v3503_v20 = vld [vmem:[%s4133_s10 + $0x84] sm:$0xf0]  ;;  %v3393_v19 = vld [vmem:[%s4123_s20 + $0x1e0] sm:$0xf]  ;;  %p3815_p6 = pneg %p3814_p5 }
  0x79   : > { %1181 = vmatpush.bf16.msrb.mxu3 %v4346_v38  ;;  %1107 = vmatpush.bf16.msra.mxu1 %v4389_v34  ;;  %5622 = vst [vmem:[#allocation52_spill] sm:$0xff] %v4422_v32  ;;  %v4438_v23 = vor.u32 %v3503_v20, %v2961_v15  ;;  %v3011_v15 = vld [vmem:[%s4133_s10 + $0xe8] sm:$0xf0]  ;;  %v3467_v28 = vld [vmem:[%s4123_s20 + $0x164] sm:$0xf0] }
  0x7a   : > { %5623 = vst [vmem:[#allocation53_spill] sm:$0xff] %v4426_v46  ;;  %v3463_v12 = vld [vmem:[%s4123_s20 + $0x144] sm:$0xf0]  ;;  %p3820_p13 = pnand %p3819_p10, %p3815_p6 }
  0x7b   : > { %5624 = vst [vmem:[#allocation54_spill] sm:$0xff] %v4438_v23 }
  0x7c   : > { %1142 = vmatpush.bf16.msrb.mxu0 %v4342_v36  ;;  %1168 = vmatpush.bf16.msrb.mxu2 %v4344_v37 }
  0x7d   : > { %1182 = vmatpush.bf16.msrb.mxu3 %v4366_v10  ;;  %v585_v41 = vld.sshfl [vmem:[#allocation1] sm:$0xff pattern:$0x73625140]  ;;  %v586_v42 = vld.sshfl [vmem:[#allocation1 + $0x8] sm:$0xff pattern:$0x73625140]  ;;  %1108 = vmatpush.bf16.msra.mxu1 %v4415_v22 }
  0x7e   : > { %1738 = vxpose.binary.xlu0.c.b16.cont [2/16] %v4239_v4, %v4237_v3, 128  ;;  %v587_v58 = vld.sshfl [vmem:[#allocation1 + $0x10] sm:$0xff pattern:$0x73625140]  ;;  %v588_v59 = vld.sshfl [vmem:[#allocation1 + $0x18] sm:$0xff pattern:$0x73625140] }
  0x7f   : > { %1764 = vxpose.binary.xlu1.c.b16.cont [4/16] %v4243_v8, %v4241_v5, 128  ;;  %742 = vst [vmem:[#allocation1] ss:$4 sm:$0xff] %v740_v27  ;;  %v3516_v27 = vld [vmem:[%s4133_s10 + $0xf4] sm:$0xf]  ;;  %v3377_v3 = vld [vmem:[%s4123_s20 + $0x1c0] sm:$0xf] }
  0x80   : > { %1143 = vmatpush.bf16.msrb.mxu0 %v4370_v11  ;;  %1169 = vmatpush.bf16.msrb.mxu2 %v4372_v14 }
  0x81   : > { %1183 = vmatpush.bf16.msrb.mxu3 %v4394_v47 }
  0x82   : > { %1692 = vxpose.binary.xlu2.c.b16.cont [4/16] %v4363_v1, %v4288_v50, 128 }
  0x84   : > { %1144 = vmatpush.bf16.msrb.mxu0 %v4400_v56  ;;  %1170 = vmatpush.bf16.msrb.mxu2 %v4402_v57 }
  0x85   : > { %1184 = vmatpush.bf16.msrb.mxu3 %v4312_v0 }
  0x88   : > { %1145 = vmatpush.bf16.msrb.mxu0 %v4422_v32  ;;  %1171 = vmatpush.bf16.msrb.mxu2 %v4426_v46 }
  0x89   : > { %1185 = vmatpush.bf16.msrb.mxu3 %v4243_v8 }
  0x8c   : > { %1146 = vmatpush.bf16.msrb.mxu0 %v4363_v1  ;;  %1172 = vmatpush.bf16.msrb.mxu2 %v4396_v54 }
  0x8d   : > { %1186 = vmatpush.bf16.msrb.mxu3 %v4179_v31 }
  0x8e   : > { %1739 = vxpose.binary.xlu0.c.b16.cont [3/16] %v4310_v62, %v4308_v61, 128 }
  0x8f   : > { %1765 = vxpose.binary.xlu1.c.b16.cont [5/16] %v4312_v0, %v4253_v16, 128  ;;  %v3019_v0 = vld [vmem:[%s4133_s10 + $0xf8] sm:$0xf0] }
  0x90   : > { %1147 = vmatpush.bf16.msrb.mxu0 %v4283_v44  ;;  %1173 = vmatpush.bf16.msrb.mxu2 %v4310_v62  ;;  %v2987_v44 = vld [vmem:[%s4133_s10 + $0xb8] sm:$0xf0] }
  0x91   : > { %1187 = vmatpush.bf16.msrb.mxu3 %v4151_v13  ;;  %v2995_v13 = vld [vmem:[%s4133_s10 + $0xc8] sm:$0xf0]  ;;  %v2971_v62 = vld [vmem:[%s4133_s10 + $0x98] sm:$0xf0] }
  0x92   : > { %1693 = vxpose.binary.xlu2.c.b16.cont [5/16] %v4422_v32, %v4266_v25, 128  ;;  %v2963_v32 = vld [vmem:[%s4133_s10 + $0x88] sm:$0xf0] }
  0x94   : > { %1148 = vmatpush.bf16.msrb.mxu0 %v4202_v45  ;;  %1174 = vmatpush.bf16.msrb.mxu2 %v4239_v4  ;;  %v3508_v4 = vld [vmem:[%s4133_s10 + $0xb4] sm:$0xf] }
  0x95   : > { %1188 = vmatpush.bf16.msrb.mxu3 %v4141_v7 }
  0x98   : > { %1149 = vmatpush.bf16.msrb.mxu0 %v4159_v18  ;;  %1175 = vmatpush.bf16.msrb.mxu2 %v4175_v29  ;;  %v2979_v18 = vld [vmem:[%s4133_s10 + $0xa8] sm:$0xf0] }
  0x9e   : > { %1740 = vxpose.binary.xlu0.c.b16.cont [4/16] %v4396_v54, %v4294_v52, 128  ;;  %v3502_v54 = vld [vmem:[%s4133_s10 + $0x84] sm:$0xf] }
  0x9f   : > { %1766 = vxpose.binary.xlu1.c.b16.cont [6/16] %v4394_v47, %v4232_v63, 128  ;;  %v2969_v47 = vld [vmem:[%s4133_s10 + $0x90] sm:$0xf] }
  0xa0   : > { %v4432_v2 = vor.u32 %v3505_v6, %v2969_v47  ;;  %v4446_v6 = vor.u32 %v3516_v27, %v3019_v0  ;;  %v3514_v47 = vld [vmem:[%s4133_s10 + $0xe4] sm:$0xf]  ;;  %v3512_v0 = vld [vmem:[%s4133_s10 + $0xd4] sm:$0xf]  ;;  %v3003_v27 = vld [vmem:[%s4133_s10 + $0xd8] sm:$0xf0] }
  0xa1   : > { %v4456_v20 = vor.u32 %v3514_v47, %v3011_v15  ;;  %v4468_v47 = vor.u32 %v3512_v0, %v3003_v27  ;;  %v3510_v15 = vld [vmem:[%s4133_s10 + $0xc4] sm:$0xf]  ;;  %v4482_v0 = vor.u32 %v3508_v4, %v2987_v44  ;;  %v3504_v44 = vld [vmem:[%s4133_s10 + $0x94] sm:$0xf] }
  0xa2   : > { %1109 = vmatpush.bf16.msra.mxu1 %v4432_v2  ;;  %5625 = vst [vmem:[#allocation55_spill] sm:$0xff] %v4446_v6  ;;  %v4475_v45 = vor.u32 %v3510_v15, %v2995_v13  ;;  %v3506_v27 = vld [vmem:[%s4133_s10 + $0xa4] sm:$0xf] }
  0xa3   : > { %5626 = vst [vmem:[#allocation56_spill] sm:$0xff] %v4456_v20  ;;  %1694 = vxpose.binary.xlu2.c.b16.cont [6/16] %v4400_v56, %v4255_v17, 128  ;;  %v4487_v7 = vor.u32 %v3506_v27, %v2979_v18  ;;  %v3329_v56 = vld [vmem:[%s4123_s20 + $0x160] sm:$0xf] }
  0xa6   : > { %1110 = vmatpush.bf16.msra.mxu1 %v4438_v23 }
  0xaa   : > { %1155 = vmatpush.bf16.msrb.mxu1 %v4446_v6 }
  0xae   : > { %1741 = vxpose.binary.xlu0.c.b16.cont [5/16] %v4426_v46, %v4273_v33, 128  ;;  %v3435_v46 = vld [vmem:[%s4123_s20 + $0x64] sm:$0xf0] }
  0xaf   : > { %1767 = vxpose.binary.xlu1.c.b16.cont [7/16] %v4366_v10, %v4220_v55, 128 }
  0xb0   : > { %1156 = vmatpush.bf16.msrb.mxu1 %v4456_v20 }
  0xb3   : > { %1695 = vxpose.binary.xlu2.c.b16.cont [7/16] %v4370_v11, %v4210_v49, 128 }
  0xb4   : > { %1157 = vmatpush.bf16.msrb.mxu1 %v4468_v47 }
  0xb8   : > { %1158 = vmatpush.bf16.msrb.mxu1 %v4475_v45 }
  0xbc   : > { %1159 = vmatpush.bf16.msrb.mxu1 %v4482_v0 }
  0xbe   : > { %v581_v29 = vpop.permute.xlu0 %580  ;;  %1742 = vxpose.binary.xlu0.c.b16.cont [6/16] %v4402_v57, %v4260_v21, 128 }
  0xbf   : > { %1768 = vxpose.binary.xlu1.c.b16.end [8/16] %v4346_v38, %v4195_v40, 128  ;;  %v593_v13 = vmul.f32 %v585_v41, %v581_v29  ;;  %v594_v15 = vmul.f32 %v586_v42, %v581_v29  ;;  %v595_v31 = vmul.f32 %v587_v58, %v581_v29  ;;  %v4503_v42 = vld.sshfl [vmem:[#allocation1 + $0x8] sm:$0xff pattern:$0x73625140]  ;;  %v4505_v58 = vld.sshfl [vmem:[#allocation1 + $0x10] sm:$0xff pattern:$0x73625140] }
  0xc0   : > { %v596_v4 = vmul.f32 %v588_v59, %v581_v29  ;;  %1160 = vmatpush.bf16.msrb.mxu1 %v4487_v7  ;;  %v4499_v41 = vor.u32 %v3504_v44, %v2971_v62  ;;  %v4501_v29 = vld.sshfl [vmem:[#allocation1] sm:$0xff pattern:$0x73625140]  ;;  %v3337_v44 = vld [vmem:[%s4123_s20 + $0x170] sm:$0xf] }
  0xc1   : > { %v601_v1 = vrot.slane %v594_v15, 6  ;;  %v602_v18 = vrot.slane %v595_v31, 4  ;;  %v3209_v15 = vld [vmem:[%s4123_s20 + $0x70] sm:$0xf] }
  0xc2   : > { %v603_v27 = vrot.slane %v596_v4, 2  ;;  %v3437_v4 = vld [vmem:[%s4123_s20 + $0x74] sm:$0xf0] }
  0xc3   : > { %v605_v8 = vsel %vm604_vm0, %v593_v13, %v601_v1  ;;  %v4507_v1 = vld.sshfl [vmem:[#allocation1 + $0x18] sm:$0xff pattern:$0x73625140]  ;;  %v4511_v13 = vor.u32 %v3502_v54, %v2963_v32  ;;  %v3453_v54 = vld [vmem:[%s4123_s20 + $0xf4] sm:$0xf0]  ;;  %1696 = vxpose.binary.xlu2.c.b16.end [8/16] %v4342_v36, %v4188_v35, 128 }
  0xc4   : > { %v607_v31 = vsel %vm606_vm1, %v602_v18, %v603_v27  ;;  %1161 = vmatpush.bf16.msrb.mxu1 %v4499_v41  ;;  %v3469_v18 = vld [vmem:[%s4123_s20 + $0x174] sm:$0xf0] }
  0xc5   : > { %v609_v59 = vsel %vm608_vm2, %v605_v8, %v607_v31  ;;  %5627 = vst [vmem:[#allocation57_spill] sm:$0xff] %v4511_v13  ;;  %v3401_v8 = vld [vmem:[%s4123_s20 + $0x1f0] sm:$0xf]  ;;  %v3485_v27 = vld [vmem:[%s4123_s20 + $0x1f4] sm:$0xf0]  ;;  %v3338_v10 = vor.u32 %v3469_v18, %v3337_v44 }
  0xc6   : > { %v611_v62 = vadd.f32 %v609_v59, %v4383_v24  ;;  %v3201_v31 = vld [vmem:[%s4123_s20 + $0x60] sm:$0xf]  ;;  %v3273_v24 = vld [vmem:[%s4123_s20 + $0xf0] sm:$0xf]  ;;  %v3451_v18 = vld [vmem:[%s4123_s20 + $0xe4] sm:$0xf0] }
  0xc7   : > { %v3265_v44 = vld [vmem:[%s4123_s20 + $0xe0] sm:$0xf] }
  0xc8   : > { %756 = vst [vmem:[#allocation1] ss:$4 sm:$0xff] %v611_v62  ;;  %1162 = vmatpush.bf16.msrb.mxu1 %v4511_v13  ;;  %v3210_v62 = vor.u32 %v3437_v4, %v3209_v15  ;;  %v3274_v4 = vor.u32 %v3453_v54, %v3273_v24  ;;  %v3385_v24 = vld [vmem:[%s4123_s20 + $0x1d0] sm:$0xf]  ;;  %v3481_v54 = vld [vmem:[%s4123_s20 + $0x1d4] sm:$0xf0] }
  0xce   : > { %1743 = vxpose.binary.xlu0.c.b16.cont [7/16] %v4372_v14, %v4215_v53, 128  ;;  %v3402_v14 = vor.u32 %v3485_v27, %v3401_v8  ;;  %v3193_v27 = vld [vmem:[%s4123_s20 + $0x50] sm:$0xf] }
  0xcf   : > { %1713 = vxpose.binary.xlu1.c.b16.start [1/16] %v4511_v13, %v4438_v23, 128  ;;  %v757_v32 = vld.sshfl [vmem:[#allocation1] sm:$0xff pattern:$0x73625140]  ;;  %v759_v59 = vld.sshfl [vmem:[#allocation1 + $0x10] sm:$0xff pattern:$0x73625140] }
  0xd0   : > { %v4531_v6 = vpack.c.bf16 %v757_v32, %v757_v32  ;;  %v4533_v57 = vpack.c.bf16 %v759_v59, %v759_v59  ;;  %v760_v11 = vld.sshfl [vmem:[#allocation1 + $0x18] sm:$0xff pattern:$0x73625140]  ;;  %v758_v20 = vld.sshfl [vmem:[#allocation1 + $0x8] sm:$0xff pattern:$0x73625140] }
  0xd1   : > { %v4535_v38 = vpack.c.bf16 %v760_v11, %v760_v11  ;;  %v3483_v13 = vld [vmem:[%s4123_s20 + $0x1e4] sm:$0xf0]  ;;  %v4540_v15 = vpack.c.bf16 %v758_v20, %v758_v20  ;;  %v3202_v11 = vor.u32 %v3435_v46, %v3201_v31  ;;  %v3330_v20 = vor.u32 %v3467_v28, %v3329_v56  ;;  %v3433_v32 = vld [vmem:[%s4123_s20 + $0x54] sm:$0xf0]  ;;  %v3321_v59 = vld [vmem:[%s4123_s20 + $0x150] sm:$0xf] }
  0xd2   : > { %1098 = vmatmul.bf16.vlgmr.msra.gmra.mxu0 %v4531_v6  ;;  %1124 = vmatmul.bf16.vlgmr.msra.gmra.mxu2 %v4533_v57  ;;  %v3394_v8 = vor.u32 %v3483_v13, %v3393_v19  ;;  %v3465_v23 = vld [vmem:[%s4123_s20 + $0x154] sm:$0xf0]  ;;  %v3185_v28 = vld [vmem:[%s4123_s20 + $0x40] sm:$0xf]  ;;  %v3431_v19 = vld [vmem:[%s4123_s20 + $0x44] sm:$0xf0]  ;;  %v3386_v46 = vor.u32 %v3481_v54, %v3385_v24 }
  0xd3   : > { %1137 = vmatmul.bf16.vlgmr.msra.gmra.mxu3 %v4535_v38  ;;  %1514 = vmatpush.bf16.msra.mxu0 %v3210_v62  ;;  %v3322_v56 = vor.u32 %v3465_v23, %v3321_v59  ;;  %v3313_v13 = vld [vmem:[%s4123_s20 + $0x140] sm:$0xf]  ;;  %v3257_v31 = vld [vmem:[%s4123_s20 + $0xd0] sm:$0xf]  ;;  %v3449_v62 = vld [vmem:[%s4123_s20 + $0xd4] sm:$0xf0]  ;;  %v3186_v23 = vor.u32 %v3431_v19, %v3185_v28 }
  0xd4   : > { %1540 = vmatpush.bf16.msra.mxu2 %v3338_v10  ;;  %1553 = vmatpush.bf16.msra.mxu3 %v3402_v14  ;;  %v3266_v10 = vor.u32 %v3451_v18, %v3265_v44  ;;  %v3194_v14 = vor.u32 %v3433_v32, %v3193_v27  ;;  %v3314_v44 = vor.u32 %v3463_v12, %v3313_v13  ;;  %v3305_v27 = vld [vmem:[%s4123_s20 + $0x130] sm:$0xf]  ;;  %v3461_v32 = vld [vmem:[%s4123_s20 + $0x134] sm:$0xf0]  ;;  %v3249_v54 = vld [vmem:[%s4123_s20 + $0xc0] sm:$0xf] }
  0xd5   : > { %1111 = vmatmul.bf16.vlgmr.msra.gmra.mxu1 %v4540_v15  ;;  %v3369_v59 = vld [vmem:[%s4123_s20 + $0x1b0] sm:$0xf]  ;;  %v3477_v24 = vld [vmem:[%s4123_s20 + $0x1b4] sm:$0xf0]  ;;  %v3169_v28 = vld [vmem:[%s4123_s20 + $0x20] sm:$0xf] }
  0xd6   : > { %1527 = vmatpush.bf16.msra.mxu1 %v3274_v4  ;;  %v3479_v4 = vld [vmem:[%s4123_s20 + $0x1c4] sm:$0xf0]  ;;  %v3361_v13 = vld [vmem:[%s4123_s20 + $0x1a0] sm:$0xf] }
  0xd7   : > { %1515 = vmatpush.bf16.msra.mxu0 %v3202_v11  ;;  %v3258_v11 = vor.u32 %v3449_v62, %v3257_v31  ;;  %v3378_v18 = vor.u32 %v3479_v4, %v3377_v3  ;;  %v3306_v3 = vor.u32 %v3461_v32, %v3305_v27  ;;  %v3427_v19 = vld [vmem:[%s4123_s20 + $0x24] sm:$0xf0]  ;;  %v3241_v4 = vld [vmem:[%s4123_s20 + $0xb0] sm:$0xf]  ;;  %v3473_v32 = vld [vmem:[%s4123_s20 + $0x194] sm:$0xf0] }
  0xd8   : > { %1541 = vmatpush.bf16.msra.mxu2 %v3330_v20  ;;  %1554 = vmatpush.bf16.msra.mxu3 %v3394_v8  ;;  %v3177_v20 = vld [vmem:[%s4123_s20 + $0x30] sm:$0xf]  ;;  %v3429_v8 = vld [vmem:[%s4123_s20 + $0x34] sm:$0xf0]  ;;  %v3475_v31 = vld [vmem:[%s4123_s20 + $0x1a4] sm:$0xf0] }
  0xd9   : > { %v3178_v12 = vor.u32 %v3429_v8, %v3177_v20  ;;  %v3161_v20 = vld [vmem:[%s4123_s20 + $0x10] sm:$0xf]  ;;  %v3425_v8 = vld [vmem:[%s4123_s20 + $0x14] sm:$0xf0] }
  0xda   : > { %1528 = vmatpush.bf16.msra.mxu1 %v3266_v10  ;;  %v3447_v10 = vld [vmem:[%s4123_s20 + $0xc4] sm:$0xf0]  ;;  %v3289_v27 = vld [vmem:[%s4123_s20 + $0x110] sm:$0xf] }
  0xdb   : > { %1516 = vmatpush.bf16.msra.mxu0 %v3194_v14  ;;  %v3370_v14 = vor.u32 %v3477_v24, %v3369_v59  ;;  %v3250_v62 = vor.u32 %v3447_v10, %v3249_v54  ;;  %v3233_v24 = vld [vmem:[%s4123_s20 + $0xa0] sm:$0xf]  ;;  %v3162_v54 = vor.u32 %v3425_v8, %v3161_v20  ;;  %v3403_v20 = vld [vmem:[%s4123_s20 + $0x1f8] sm:$0xf0]  ;;  %v3225_v8 = vld [vmem:[%s4123_s20 + $0x90] sm:$0xf] }
  0xdc   : > { %1542 = vmatpush.bf16.msra.mxu2 %v3322_v56  ;;  %1555 = vmatpush.bf16.msra.mxu3 %v3386_v46  ;;  %v3297_v56 = vld [vmem:[%s4123_s20 + $0x120] sm:$0xf]  ;;  %v3459_v46 = vld [vmem:[%s4123_s20 + $0x124] sm:$0xf0] }
  0xde   : > { %1744 = vxpose.binary.xlu0.c.b16.end [8/16] %v4344_v37, %v4193_v39, 128 }
  0xdf   : > { %1517 = vmatpush.bf16.msra.mxu0 %v3186_v23  ;;  %1529 = vmatpush.bf16.msra.mxu1 %v3258_v11  ;;  %v3445_v23 = vld [vmem:[%s4123_s20 + $0xb4] sm:$0xf0]  ;;  %v3170_v11 = vor.u32 %v3427_v19, %v3169_v28  ;;  %v3281_v28 = vld [vmem:[%s4123_s20 + $0x100] sm:$0xf]  ;;  %v3455_v19 = vld [vmem:[%s4123_s20 + $0x104] sm:$0xf0] }
  0xe0   : > { %1543 = vmatpush.bf16.msra.mxu2 %v3314_v44  ;;  %1556 = vmatpush.bf16.msra.mxu3 %v3378_v18  ;;  %v3298_v44 = vor.u32 %v3459_v46, %v3297_v56  ;;  %v3362_v18 = vor.u32 %v3475_v31, %v3361_v13  ;;  %v3242_v59 = vor.u32 %v3445_v23, %v3241_v4  ;;  %v3345_v56 = vld [vmem:[%s4123_s20 + $0x180] sm:$0xf]  ;;  %v3471_v46 = vld [vmem:[%s4123_s20 + $0x184] sm:$0xf0]  ;;  %v3436_v13 = vld [vmem:[%s4123_s20 + $0x74] sm:$0xf] }
  0xe1   : > { %1714 = vxpose.binary.xlu1.c.b16.cont [2/16] %v4499_v41, %v4432_v2, 128  ;;  %v3211_v31 = vld [vmem:[%s4123_s20 + $0x78] sm:$0xf0]  ;;  %v3468_v4 = vld [vmem:[%s4123_s20 + $0x174] sm:$0xf] }
  0xe2   : > { %1150 = vmatmul.bf16.vlgmr.msrb.gmra.mxu0 %v4531_v6  ;;  %1176 = vmatmul.bf16.vlgmr.msrb.gmra.mxu2 %v4533_v57  ;;  %v3457_v6 = vld [vmem:[%s4123_s20 + $0x114] sm:$0xf0]  ;;  %v3353_v57 = vld [vmem:[%s4123_s20 + $0x190] sm:$0xf]  ;;  %v3339_v23 = vld [vmem:[%s4123_s20 + $0x178] sm:$0xf0] }
  0xe3   : > { %1518 = vmatpush.bf16.msra.mxu0 %v3178_v12  ;;  %1189 = vmatmul.bf16.vlgmr.msrb.gmra.mxu3 %v4535_v38  ;;  %v3443_v38 = vld [vmem:[%s4123_s20 + $0xa4] sm:$0xf0]  ;;  %v3290_v10 = vor.u32 %v3457_v6, %v3289_v27  ;;  %v3354_v12 = vor.u32 %v3473_v32, %v3353_v57  ;;  %v3441_v27 = vld [vmem:[%s4123_s20 + $0x94] sm:$0xf0]  ;;  %v3214_v6 = vor.u32 %v3436_v13, %v3211_v31  ;;  %v3434_v32 = vld [vmem:[%s4123_s20 + $0x64] sm:$0xf] }
  0xe4   : > { %1544 = vmatpush.bf16.msra.mxu2 %v3306_v3  ;;  %1557 = vmatpush.bf16.msra.mxu3 %v3370_v14  ;;  %v3153_v3 = vld [vmem:[%s4123_s20] sm:$0xf]  ;;  %v3423_v14 = vld [vmem:[%s4123_s20 + $0x4] sm:$0xf0]  ;;  %v3342_v57 = vor.u32 %v3468_v4, %v3339_v23  ;;  %v4632_v13 = vpack.c.bf16 %v4507_v1, %v4507_v1  ;;  %v3195_v4 = vld [vmem:[%s4123_s20 + $0x58] sm:$0xf0] }
  0xe5   : > { %1530 = vmatpush.bf16.msra.mxu1 %v3250_v62  ;;  %v3154_v62 = vor.u32 %v3423_v14, %v3153_v3  ;;  %v3395_v3 = vld [vmem:[%s4123_s20 + $0x1e8] sm:$0xf0]  ;;  %v3217_v14 = vld [vmem:[%s4123_s20 + $0x80] sm:$0xf]  ;;  %v3464_v23 = vld [vmem:[%s4123_s20 + $0x154] sm:$0xf] }
  0xe6   : > { %1163 = vmatmul.bf16.vlgmr.msrb.gmra.mxu1 %v4540_v15  ;;  %v3234_v15 = vor.u32 %v3443_v38, %v3233_v24  ;;  %v3466_v38 = vld [vmem:[%s4123_s20 + $0x164] sm:$0xf]  ;;  %v3387_v1 = vld [vmem:[%s4123_s20 + $0x1d8] sm:$0xf0] }
  0xe7   : > { %1519 = vmatpush.bf16.msra.mxu0 %v3170_v11  ;;  %v3484_v11 = vld [vmem:[%s4123_s20 + $0x1f4] sm:$0xf] }
  0xe8   : > { %1545 = vmatpush.bf16.msra.mxu2 %v3298_v44  ;;  %1558 = vmatpush.bf16.msra.mxu3 %v3362_v18  ;;  %v3282_v44 = vor.u32 %v3455_v19, %v3281_v28  ;;  %v3346_v18 = vor.u32 %v3471_v46, %v3345_v56  ;;  %v3406_v24 = vor.u32 %v3484_v11, %v3403_v20  ;;  %v3439_v28 = vld [vmem:[%s4123_s20 + $0x84] sm:$0xf0]  ;;  %v3452_v46 = vld [vmem:[%s4123_s20 + $0xf4] sm:$0xf]  ;;  %v3323_v11 = vld [vmem:[%s4123_s20 + $0x158] sm:$0xf0] }
  0xe9   : > { %1531 = vmatpush.bf16.msra.mxu1 %v3242_v59  ;;  %v3203_v59 = vld [vmem:[%s4123_s20 + $0x68] sm:$0xf0]  ;;  %v4620_v19 = vpack.c.bf16 %v4501_v29, %v4501_v29  ;;  %v4624_v56 = vpack.c.bf16 %v4505_v58, %v4505_v58 }
  0xea   : > { %v3206_v29 = vor.u32 %v3434_v32, %v3203_v59  ;;  %v3430_v32 = vld [vmem:[%s4123_s20 + $0x44] sm:$0xf] }
  0xeb   : > { %1520 = vmatpush.bf16.msra.mxu0 %v3162_v54  ;;  %v3331_v54 = vld [vmem:[%s4123_s20 + $0x168] sm:$0xf0] }
  0xec   : > { %1546 = vmatpush.bf16.msra.mxu2 %v3290_v10  ;;  %1559 = vmatpush.bf16.msra.mxu3 %v3354_v12  ;;  %v3482_v10 = vld [vmem:[%s4123_s20 + $0x1e4] sm:$0xf]  ;;  %v3226_v12 = vor.u32 %v3441_v27, %v3225_v8  ;;  %v3334_v31 = vor.u32 %v3466_v38, %v3331_v54  ;;  %v3267_v27 = vld [vmem:[%s4123_s20 + $0xe8] sm:$0xf0] }
  0xed   : > { %1532 = vmatpush.bf16.msra.mxu1 %v3234_v15  ;;  %v3275_v15 = vld [vmem:[%s4123_s20 + $0xf8] sm:$0xf0]  ;;  %v3398_v58 = vor.u32 %v3482_v10, %v3395_v3  ;;  %v3450_v8 = vld [vmem:[%s4123_s20 + $0xe4] sm:$0xf]  ;;  %v3315_v54 = vld [vmem:[%s4123_s20 + $0x148] sm:$0xf0]  ;;  %v4651_v10 = vpack.c.bf16 %v4503_v42, %v4503_v42 }
  0xee   : > { %v3278_v20 = vor.u32 %v3452_v46, %v3275_v15  ;;  %v3462_v38 = vld [vmem:[%s4123_s20 + $0x144] sm:$0xf]  ;;  %v3379_v3 = vld [vmem:[%s4123_s20 + $0x1c8] sm:$0xf0]  ;;  %v3259_v46 = vld [vmem:[%s4123_s20 + $0xd8] sm:$0xf0] }
  0xef   : > { %1521 = vmatpush.bf16.msra.mxu0 %v3154_v62  ;;  %v3432_v62 = vld [vmem:[%s4123_s20 + $0x54] sm:$0xf] }
  0xf0   : > { %1547 = vmatpush.bf16.msra.mxu2 %v3282_v44  ;;  %1560 = vmatpush.bf16.msra.mxu3 %v3346_v18  ;;  %v3218_v44 = vor.u32 %v3439_v28, %v3217_v14  ;;  %v3480_v18 = vld [vmem:[%s4123_s20 + $0x1d4] sm:$0xf]  ;;  %v3270_v14 = vor.u32 %v3450_v8, %v3267_v27 }
  0xf1   : > { %1715 = vxpose.binary.xlu1.c.b16.cont [3/16] %v4487_v7, %v4415_v22, 128  ;;  %v3390_v59 = vor.u32 %v3480_v18, %v3387_v1  ;;  %v3448_v28 = vld [vmem:[%s4123_s20 + $0xd4] sm:$0xf]  ;;  %v3446_v1 = vld [vmem:[%s4123_s20 + $0xc4] sm:$0xf] }
  0xf2   : > { %1533 = vmatpush.bf16.msra.mxu1 %v3226_v12  ;;  %1522 = vmatmul.bf16.vlgmr.msra.gmra.mxu0 %v4620_v19  ;;  %v3478_v12 = vld [vmem:[%s4123_s20 + $0x1c4] sm:$0xf]  ;;  %v3262_v18 = vor.u32 %v3448_v28, %v3259_v46 }
  0xf3   : > { %1566 = vmatpush.bf16.msrb.mxu0 %v3214_v6  ;;  %1548 = vmatmul.bf16.vlgmr.msra.gmra.mxu2 %v4624_v56  ;;  %v3198_v6 = vor.u32 %v3432_v62, %v3195_v4  ;;  %v3382_v62 = vor.u32 %v3478_v12, %v3379_v3  ;;  %v3460_v4 = vld [vmem:[%s4123_s20 + $0x134] sm:$0xf] }
  0xf4   : > { %1592 = vmatpush.bf16.msrb.mxu2 %v3342_v57  ;;  %1605 = vmatpush.bf16.msrb.mxu3 %v3406_v24  ;;  %v3326_v57 = vor.u32 %v3464_v23, %v3323_v11  ;;  %v3187_v24 = vld [vmem:[%s4123_s20 + $0x48] sm:$0xf0]  ;;  %v3307_v23 = vld [vmem:[%s4123_s20 + $0x138] sm:$0xf0]  ;;  %v3476_v11 = vld [vmem:[%s4123_s20 + $0x1b4] sm:$0xf] }
  0xf5   : > { %1561 = vmatmul.bf16.vlgmr.msra.gmra.mxu3 %v4632_v13  ;;  %v3190_v15 = vor.u32 %v3430_v32, %v3187_v24  ;;  %v3310_v27 = vor.u32 %v3460_v4, %v3307_v23  ;;  %v3171_v32 = vld [vmem:[%s4123_s20 + $0x28] sm:$0xf0]  ;;  %v3444_v3 = vld [vmem:[%s4123_s20 + $0xb4] sm:$0xf]  ;;  %v3291_v4 = vld [vmem:[%s4123_s20 + $0x118] sm:$0xf0] }
  0xf6   : > { %1534 = vmatpush.bf16.msra.mxu1 %v3218_v44  ;;  %v3371_v44 = vld [vmem:[%s4123_s20 + $0x1b8] sm:$0xf0]  ;;  %v3299_v24 = vld [vmem:[%s4123_s20 + $0x128] sm:$0xf0]  ;;  %v3472_v23 = vld [vmem:[%s4123_s20 + $0x194] sm:$0xf] }
  0xf7   : > { %1567 = vmatpush.bf16.msrb.mxu0 %v3206_v29  ;;  %v3318_v29 = vor.u32 %v3462_v38, %v3315_v54  ;;  %v3474_v38 = vld [vmem:[%s4123_s20 + $0x1a4] sm:$0xf]  ;;  %v3363_v54 = vld [vmem:[%s4123_s20 + $0x1a8] sm:$0xf0] }
  0xf8   : > { %1593 = vmatpush.bf16.msrb.mxu2 %v3334_v31  ;;  %1606 = vmatpush.bf16.msrb.mxu3 %v3398_v58  ;;  %v3428_v31 = vld [vmem:[%s4123_s20 + $0x34] sm:$0xf]  ;;  %v3179_v58 = vld [vmem:[%s4123_s20 + $0x38] sm:$0xf0] }
  0xf9   : > { %1535 = vmatmul.bf16.vlgmr.msra.gmra.mxu1 %v4651_v10  ;;  %v3182_v8 = vor.u32 %v3428_v31, %v3179_v58  ;;  %v3366_v31 = vor.u32 %v3474_v38, %v3363_v54  ;;  %v3456_v58 = vld [vmem:[%s4123_s20 + $0x114] sm:$0xf]  ;;  %v3347_v38 = vld [vmem:[%s4123_s20 + $0x188] sm:$0xf0] }
  0xfa   : > { %1579 = vmatpush.bf16.msrb.mxu1 %v3278_v20  ;;  %v3251_v20 = vld [vmem:[%s4123_s20 + $0xc8] sm:$0xf0] }
  0xfb   : > { %1568 = vmatpush.bf16.msrb.mxu0 %v3198_v6  ;;  %v4658_v42 = vpop.trf.xlu1  ;;  %v3426_v6 = vld [vmem:[%s4123_s20 + $0x24] sm:$0xf]  ;;  %v3254_v12 = vor.u32 %v3446_v1, %v3251_v20  ;;  %v3235_v1 = vld [vmem:[%s4123_s20 + $0xa8] sm:$0xf0] }
  0xfc   : > { %1594 = vmatpush.bf16.msrb.mxu2 %v3326_v57  ;;  %1607 = vmatpush.bf16.msrb.mxu3 %v3390_v59  ;;  %v3374_v57 = vor.u32 %v3476_v11, %v3371_v44  ;;  %v3458_v59 = vld [vmem:[%s4123_s20 + $0x124] sm:$0xf]  ;;  %v3174_v28 = vor.u32 %v3426_v6, %v3171_v32  ;;  %v3355_v11 = vld [vmem:[%s4123_s20 + $0x198] sm:$0xf0] }
  0xfd   : > { %v3302_v46 = vor.u32 %v3458_v59, %v3299_v24  ;;  %v3358_v6 = vor.u32 %v3472_v23, %v3355_v11  ;;  %v3454_v32 = vld [vmem:[%s4123_s20 + $0x104] sm:$0xf]  ;;  %v3283_v59 = vld [vmem:[%s4123_s20 + $0x108] sm:$0xf0] }
  0xfe   : > { %1580 = vmatpush.bf16.msrb.mxu1 %v3270_v14  ;;  %v3243_v14 = vld [vmem:[%s4123_s20 + $0xb8] sm:$0xf0]  ;;  %v3470_v24 = vld [vmem:[%s4123_s20 + $0x184] sm:$0xf] }
  0xff   : > { %1569 = vmatpush.bf16.msrb.mxu0 %v3190_v15  ;;  %v3424_v15 = vld [vmem:[%s4123_s20 + $0x14] sm:$0xf]  ;;  %v3246_v44 = vor.u32 %v3444_v3, %v3243_v14  ;;  %v3286_v3 = vor.u32 %v3454_v32, %v3283_v59  ;;  %v5654_v11 = vld [vmem:[#allocation42_spill] sm:$0xff]  ;;  %v5663_v32 = vld [vmem:[#allocation35_spill] sm:$0xff] }
 0x100   : > { %1595 = vmatpush.bf16.msrb.mxu2 %v3318_v29  ;;  %1608 = vmatpush.bf16.msrb.mxu3 %v3382_v62  ;;  %v3163_v62 = vld [vmem:[%s4123_s20 + $0x18] sm:$0xf0]  ;;  %v5665_v59 = vld [vmem:[#allocation38_spill] sm:$0xff] }
 0x101   : > { %1716 = vxpose.binary.xlu1.c.b16.cont [4/16] %v4482_v0, %v4389_v34, 128  ;;  %v3166_v20 = vor.u32 %v3424_v15, %v3163_v62  ;;  %v3227_v15 = vld [vmem:[%s4123_s20 + $0x98] sm:$0xf0] }
 0x102   : > { %1581 = vmatpush.bf16.msrb.mxu1 %v3262_v18  ;;  %v3442_v18 = vld [vmem:[%s4123_s20 + $0xa4] sm:$0xf] }
 0x103   : > { %1570 = vmatpush.bf16.msrb.mxu0 %v3182_v8  ;;  %v4679_v29 = vpop.trf.xlu1  ;;  %v3294_v8 = vor.u32 %v3456_v58, %v3291_v4  ;;  %v3238_v54 = vor.u32 %v3442_v18, %v3235_v1  ;;  %v3438_v58 = vld [vmem:[%s4123_s20 + $0x84] sm:$0xf]  ;;  %v3219_v4 = vld [vmem:[%s4123_s20 + $0x88] sm:$0xf0]  ;;  %v5656_v18 = vld [vmem:[#allocation49_spill] sm:$0xff] }
 0x104   : > { %1596 = vmatpush.bf16.msrb.mxu2 %v3310_v27  ;;  %1609 = vmatpush.bf16.msrb.mxu3 %v3374_v57  ;;  %5628 = vst [vmem:[#allocation58_spill] sm:$0xff] %v4679_v29  ;;  %v3422_v27 = vld [vmem:[%s4123_s20 + $0x4] sm:$0xf]  ;;  %v3155_v57 = vld [vmem:[%s4123_s20 + $0x8] sm:$0xf0] }
 0x105   : > { %v5657_v1 = vld [vmem:[#allocation39_spill] sm:$0xff] }
 0x106   : > { %1582 = vmatpush.bf16.msrb.mxu1 %v3254_v12  ;;  %v3158_v12 = vor.u32 %v3422_v27, %v3155_v57  ;;  %v5660_v27 = vld [vmem:[#allocation44_spill] sm:$0xff] }
 0x107   : > { %1571 = vmatpush.bf16.msrb.mxu0 %v3174_v28  ;;  %v3350_v28 = vor.u32 %v3470_v24, %v3347_v38  ;;  %v5667_v24 = vld [vmem:[#allocation36_spill] sm:$0xff]  ;;  %v5668_v38 = vld [vmem:[#allocation34_spill] sm:$0xff] }
 0x108   : > { %1597 = vmatpush.bf16.msrb.mxu2 %v3302_v46  ;;  %1610 = vmatpush.bf16.msrb.mxu3 %v3366_v31  ;;  %v3440_v46 = vld [vmem:[%s4123_s20 + $0x94] sm:$0xf]  ;;  %v4699_v31 = vpop.trf.xlu2 }
 0x109   : > { %v3230_v62 = vor.u32 %v3440_v46, %v3227_v15 }
 0x10a   : > { %1583 = vmatpush.bf16.msrb.mxu1 %v3246_v44  ;;  %v5655_v44 = vld [vmem:[#allocation52_spill] sm:$0xff] }
 0x10b   : > { %1572 = vmatpush.bf16.msrb.mxu0 %v3166_v20  ;;  %v4694_v14 = vpop.trf.xlu1 }
 0x10c   : > { %1598 = vmatpush.bf16.msrb.mxu2 %v3294_v8  ;;  %1611 = vmatpush.bf16.msrb.mxu3 %v3358_v6  ;;  %v5661_v6 = vld [vmem:[#allocation41_spill] sm:$0xff] }
 0x10e   : > { %1584 = vmatpush.bf16.msrb.mxu1 %v3238_v54 }
 0x10f   : > { %1573 = vmatpush.bf16.msrb.mxu0 %v3158_v12 }
 0x110   : > { %1599 = vmatpush.bf16.msrb.mxu2 %v3286_v3  ;;  %1612 = vmatpush.bf16.msrb.mxu3 %v3350_v28  ;;  %v5671_v28 = vld [vmem:[#allocation31_spill] sm:$0xff] }
 0x111   : > { %1717 = vxpose.binary.xlu1.c.b16.cont [5/16] %v4475_v45, %v4361_v60, 128 }
 0x112   : > { %1574 = vmatmul.bf16.vlgmr.msrb.gmra.mxu0 %v4620_v19  ;;  %1585 = vmatpush.bf16.msrb.mxu1 %v3230_v62  ;;  %v5649_v19 = vld [vmem:[#allocation55_spill] sm:$0xff] }
 0x113   : > { %1785 = vmatpush.bf16.msra.mxu0 %v4188_v35  ;;  %1600 = vmatmul.bf16.vlgmr.msrb.gmra.mxu2 %v4624_v56  ;;  %v4710_v23 = vpop.trf.xlu1  ;;  %v3222_v35 = vor.u32 %v3438_v58, %v3219_v4  ;;  %v5651_v56 = vld [vmem:[#allocation50_spill] sm:$0xff]  ;;  %v5673_v58 = vld [vmem:[#allocation57_spill] sm:$0xff] }
 0x114   : > { %1963 = vmatpush.bf16.msra.mxu2 %v4193_v39  ;;  %2052 = vmatpush.bf16.msra.mxu3 %v4195_v40  ;;  %5629 = vst [vmem:[#allocation59_spill] sm:$0xff] %v4710_v23  ;;  %v4718_v39 = vpop.trf.xlu2 }
 0x115   : > { %1613 = vmatmul.bf16.vlgmr.msrb.gmra.mxu3 %v4632_v13  ;;  %5630 = vst [vmem:[#allocation60_spill] sm:$0xff] %v4718_v39  ;;  %v5652_v13 = vld [vmem:[#allocation53_spill] sm:$0xff] }
 0x116   : > { %1586 = vmatpush.bf16.msrb.mxu1 %v3222_v35 }
 0x117   : > { %1786 = vmatpush.bf16.msra.mxu0 %v4210_v49 }
 0x118   : > { %1964 = vmatpush.bf16.msra.mxu2 %v4215_v53  ;;  %2053 = vmatpush.bf16.msra.mxu3 %v4220_v55 }
 0x119   : > { %1587 = vmatmul.bf16.vlgmr.msrb.gmra.mxu1 %v4651_v10 }
 0x11a   : > { %v4720_v40 = vpop.trf.xlu0  ;;  %1874 = vmatpush.bf16.msra.mxu1 %v4291_v51 }
 0x11b   : > { %1787 = vmatpush.bf16.msra.mxu0 %v4255_v17  ;;  %v4724_v49 = vpop.trf.xlu1 }
 0x11c   : > { %1965 = vmatpush.bf16.msra.mxu2 %v4260_v21  ;;  %2054 = vmatpush.bf16.msra.mxu3 %v4232_v63  ;;  %v4741_v63 = vpop.trf.xlu2  ;;  %v5635_v21 = vld [vmem:[#allocation32_spill] sm:$0xff] }
 0x11e   : > { %1875 = vmatpush.bf16.msra.mxu1 %v4323_v9 }
 0x11f   : > { %1788 = vmatpush.bf16.msra.mxu0 %v4266_v25 }
 0x120   : > { %1966 = vmatpush.bf16.msra.mxu2 %v4273_v33  ;;  %2055 = vmatpush.bf16.msra.mxu3 %v4253_v16  ;;  %v5634_v16 = vld [vmem:[#allocation29_spill] sm:$0xff] }
 0x121   : > { %1718 = vxpose.binary.xlu1.c.b16.cont [6/16] %v4468_v47, %v4337_v26, 128  ;;  %v5637_v33 = vld [vmem:[#allocation33_spill] sm:$0xff] }
 0x122   : > { %v4735_v53 = vpop.trf.xlu0  ;;  %1876 = vmatpush.bf16.msra.mxu1 %v4337_v26 }
 0x123   : > { %1789 = vmatpush.bf16.msra.mxu0 %v4288_v50  ;;  %5631 = vst [vmem:[#allocation61_spill] sm:$0xff] %v4735_v53  ;;  %v4739_v55 = vpop.trf.xlu1  ;;  %v5641_v50 = vld [vmem:[#allocation56_spill] sm:$0xff] }
 0x124   : > { %1967 = vmatpush.bf16.msra.mxu2 %v4294_v52  ;;  %2056 = vmatpush.bf16.msra.mxu3 %v4241_v5  ;;  %5632 = vst [vmem:[#allocation62_spill] sm:$0xff] %v4739_v55  ;;  %v5633_v5 = vld [vmem:[#allocation37_spill] sm:$0xff] }
 0x126   : > { %1877 = vmatpush.bf16.msra.mxu1 %v4361_v60  ;;  %v5646_v60 = vld [vmem:[#allocation46_spill] sm:$0xff] }
 0x127   : > { %1790 = vmatpush.bf16.msra.mxu0 %v4281_v43  ;;  %v5638_v43 = vld [vmem:[#allocation27_spill] sm:$0xff] }
 0x128   : > { %1968 = vmatpush.bf16.msra.mxu2 %v4308_v61  ;;  %2057 = vmatpush.bf16.msra.mxu3 %v4177_v30  ;;  %v4757_v30 = vpop.trf.xlu2  ;;  %v5643_v61 = vld [vmem:[#allocation47_spill] sm:$0xff] }
 0x129   : > { %5639 = vst [vmem:[#allocation29_spill] sm:$0xff] %v4757_v30 }
 0x12a   : > { %v4749_v17 = vpop.trf.xlu0  ;;  %1878 = vmatpush.bf16.msra.mxu1 %v4389_v34  ;;  %v5647_v34 = vld [vmem:[#allocation54_spill] sm:$0xff] }
 0x12b   : > { %1791 = vmatpush.bf16.msra.mxu0 %v4208_v48  ;;  %v4753_v25 = vpop.trf.xlu1  ;;  %v5640_v48 = vld [vmem:[#allocation43_spill] sm:$0xff] }
 0x12c   : > { %1969 = vmatpush.bf16.msra.mxu2 %v5633_v5  ;;  %2058 = vmatpush.bf16.msra.mxu3 %v5634_v16  ;;  %5636 = vst [vmem:[#allocation37_spill] sm:$0xff] %v4753_v25 }
 0x12e   : > { %1879 = vmatpush.bf16.msra.mxu1 %v4415_v22  ;;  %v5648_v22 = vld [vmem:[#allocation51_spill] sm:$0xff] }
 0x12f   : > { %1792 = vmatpush.bf16.msra.mxu0 %v5635_v21 }
 0x130   : > { %1970 = vmatpush.bf16.msra.mxu2 %v5637_v33  ;;  %2059 = vmatpush.bf16.msra.mxu3 %v5638_v43 }
 0x131   : > { %1719 = vxpose.binary.xlu1.c.b16.cont [7/16] %v5641_v50, %v4323_v9, 128  ;;  %v5650_v9 = vld [vmem:[#allocation48_spill] sm:$0xff] }
 0x132   : > { %1793 = vmatmul.bf16.vlgmr.msra.gmra.mxu0 %v4699_v31  ;;  %v4768_v52 = vpop.trf.xlu0  ;;  %1880 = vmatpush.bf16.msra.mxu1 %v4432_v2 }
 0x133   : > { %1971 = vmatmul.bf16.vlgmr.msra.gmra.mxu2 %v4720_v40  ;;  %2060 = vmatmul.bf16.vlgmr.msra.gmra.mxu3 %v4658_v42  ;;  %5642 = vst [vmem:[#allocation32_spill] sm:$0xff] %v4768_v52  ;;  %v4772_v26 = vpop.trf.xlu1 }
 0x134   : > { %2319 = vmatpush.bf16.msrb.mxu2 %v4344_v37  ;;  %2408 = vmatpush.bf16.msrb.mxu3 %v5640_v48  ;;  %5644 = vst [vmem:[#allocation33_spill] sm:$0xff] %v4772_v26  ;;  %v5645_v37 = vld [vmem:[#allocation45_spill] sm:$0xff] }
 0x135   : > { %2141 = vmatpush.bf16.msrb.mxu0 %v4342_v36  ;;  %v4778_v36 = vpop.trf.xlu2 }
 0x136   : > { %1881 = vmatpush.bf16.msra.mxu1 %v5647_v34 }
 0x138   : > { %2320 = vmatpush.bf16.msrb.mxu2 %v5643_v61  ;;  %2409 = vmatpush.bf16.msrb.mxu3 %v5645_v37 }
 0x139   : > { %2142 = vmatpush.bf16.msrb.mxu0 %v5646_v60 }
 0x13a   : > { %2230 = vmatpush.bf16.msrb.mxu1 %v5649_v19  ;;  %v4783_v2 = vpop.trf.xlu0 }
 0x13b   : > { %v4786_v10 = vpop.trf.xlu1 }
 0x13c   : > { %2321 = vmatpush.bf16.msrb.mxu2 %v5648_v22  ;;  %2410 = vmatpush.bf16.msrb.mxu3 %v5650_v9  ;;  %5653 = vst [vmem:[#allocation27_spill] sm:$0xff] %v4786_v10 }
 0x13d   : > { %2143 = vmatpush.bf16.msrb.mxu0 %v5651_v56  ;;  %v4799_v20 = vpop.trf.xlu2 }
 0x13e   : > { %2231 = vmatpush.bf16.msrb.mxu1 %v5641_v50  ;;  %5658 = vst [vmem:[#allocation43_spill] sm:$0xff] %v4799_v20 }
 0x140   : > { %2322 = vmatpush.bf16.msrb.mxu2 %v5652_v13  ;;  %2411 = vmatpush.bf16.msrb.mxu3 %v5654_v11 }
 0x141   : > { %2144 = vmatpush.bf16.msrb.mxu0 %v5655_v44 }
 0x142   : > { %1798 = vmatmul.bf16.gmra.mxu0 %v4741_v63  ;;  %2232 = vmatpush.bf16.msrb.mxu1 %v4468_v47  ;;  %v4801_v8 = vpop.trf.xlu0  ;;  %v5664_v47 = vld [vmem:[#allocation40_spill] sm:$0xff] }
 0x143   : > { %1976 = vmatmul.bf16.gmra.mxu2 %v4749_v17  ;;  %2065 = vmatmul.bf16.gmra.mxu3 %v4694_v14  ;;  %5659 = vst [vmem:[#allocation56_spill] sm:$0xff] %v4801_v8  ;;  %v4805_v57 = vpop.trf.xlu1 }
 0x144   : > { %2323 = vmatpush.bf16.msrb.mxu2 %v5656_v18  ;;  %2412 = vmatpush.bf16.msrb.mxu3 %v5657_v1  ;;  %5662 = vst [vmem:[#allocation47_spill] sm:$0xff] %v4805_v57 }
 0x145   : > { %1720 = vxpose.binary.xlu1.c.b16.end [8/16] %v5649_v19, %v4291_v51, 128  ;;  %v5666_v51 = vld [vmem:[#allocation30_spill] sm:$0xff]  ;;  %v4817_v12 = vpop.trf.xlu2 }
 0x146   : > { %2145 = vmatpush.bf16.msrb.mxu0 %v5660_v27  ;;  %2233 = vmatpush.bf16.msrb.mxu1 %v4475_v45  ;;  %v5670_v45 = vld [vmem:[#allocation28_spill] sm:$0xff] }
 0x148   : > { %2324 = vmatpush.bf16.msrb.mxu2 %v5661_v6  ;;  %2413 = vmatpush.bf16.msrb.mxu3 %v5663_v32 }
 0x14a   : > { %2146 = vmatpush.bf16.msrb.mxu0 %v5664_v47  ;;  %2234 = vmatpush.bf16.msrb.mxu1 %v4482_v0  ;;  %v4819_v3 = vpop.trf.xlu0 }
 0x14b   : > { %v4815_v54 = vpop.trf.xlu1 }
 0x14c   : > { %2325 = vmatpush.bf16.msrb.mxu2 %v5665_v59  ;;  %2414 = vmatpush.bf16.msrb.mxu3 %v5666_v51  ;;  %5669 = vst [vmem:[#allocation45_spill] sm:$0xff] %v4815_v54 }
 0x14e   : > { %2147 = vmatpush.bf16.msrb.mxu0 %v5667_v24  ;;  %2235 = vmatpush.bf16.msrb.mxu1 %v4487_v7  ;;  %v4831_v7 = vpop.trf.xlu2 }
 0x14f   : > { %v1099_v0 = vpop.f32.mrf.mxu0  ;;  %5674 = vst [vmem:[#allocation54_spill] sm:$0xff] %v4831_v7 }
 0x150   : > { %2326 = vmatpush.bf16.msrb.mxu2 %v5668_v38  ;;  %2415 = vmatpush.bf16.msrb.mxu3 %v5670_v45 }
 0x152   : > { %1803 = vmatmul.bf16.gmra.mxu0 %v4778_v36  ;;  %2236 = vmatpush.bf16.msrb.mxu1 %v4499_v41  ;;  %v1112_v46 = vpop.f32.mrf.mxu1  ;;  %v4833_v35 = vpop.trf.xlu0 }
 0x153   : > { %1981 = vmatmul.bf16.gmra.mxu2 %v4783_v2  ;;  %2070 = vmatmul.bf16.gmra.mxu3 %v4724_v49  ;;  %v4828_v15 = vpop.trf.xlu1  ;;  %v1113_v62 = vadd.f32 %v1112_v46, %v1099_v0  ;;  %5675 = vst [vmem:[#allocation51_spill] sm:$0xff] %v4833_v35 }
 0x154   : > { %2148 = vmatpush.bf16.msrb.mxu0 %v5671_v28  ;;  %5672 = vst [vmem:[#allocation46_spill] sm:$0xff] %v4828_v15 }
 0x155   : > { %v1125_v4 = vpop.f32.mrf.mxu2 }
 0x156   : > { %2237 = vmatpush.bf16.msrb.mxu1 %v5673_v58  ;;  %v1138_v5 = vpop.f32.mrf.mxu3  ;;  %v1126_v16 = vadd.f32 %v1125_v4, %v1113_v62  ;;  %v4840_v50 = vpop.trf.xlu2 }
 0x157   : > { %v1101_v21 = vpop.f32.mrf.mxu0  ;;  %5677 = vst [vmem:[#allocation48_spill] sm:$0xff] %v4840_v50 }
 0x158   : > { %v1139_v19 = vadd.f32 %v1138_v5, %v1126_v16  ;;  %v3923_v16 = vmov 0.0  }
 0x159   : > { %509 = vst [vmem:[%s4874_s8] sm:$0xf] %v3923_v16 }
 0x15a   : > { %v1114_v33 = vpop.f32.mrf.mxu1  ;;  %v4842_v37 = vpop.trf.xlu0 }
 0x15b   : > { %v4835_v43 = vpop.trf.xlu1  ;;  %5678 = vst [vmem:[#allocation50_spill] sm:$0xff] %v4842_v37 }
 0x15c   : > { %5676 = vst [vmem:[#allocation55_spill] sm:$0xff] %v4835_v43 }
 0x15d   : > { %v1127_v48 = vpop.f32.mrf.mxu2 }
 0x15e   : > { %v1140_v41 = vpop.f32.mrf.mxu3  ;;  %v4846_v13 = vpop.trf.xlu2 }
 0x15f   : > { %v1151_v61 = vpop.f32.mrf.mxu0  ;;  %5679 = vst [vmem:[#allocation53_spill] sm:$0xff] %v4846_v13 }
 0x162   : > { %1808 = vmatmul.bf16.gmra.mxu0 %v4817_v12  ;;  %v4848_v11 = vpop.trf.xlu0 }
 0x163   : > { %1986 = vmatmul.bf16.gmra.mxu2 %v4819_v3  ;;  %2075 = vmatmul.bf16.gmra.mxu3 %v4753_v25  ;;  %v4844_v60 = vpop.trf.xlu1  ;;  %v1164_v34 = vpop.f32.mrf.mxu1  ;;  %5680 = vst [vmem:[#allocation42_spill] sm:$0xff] %v4848_v11 }
 0x164   : > { %v1165_v48 = vadd.f32 %v1164_v34, %v1151_v61 }
 0x165   : > { %v1177_v22 = vpop.f32.mrf.mxu2 }
 0x166   : > { %v1190_v9 = vpop.f32.mrf.mxu3  ;;  %v4857_v47 = vpop.trf.xlu2 }
 0x167   : > { %v1153_v56 = vpop.f32.mrf.mxu0  ;;  %5683 = vst [vmem:[#allocation39_spill] sm:$0xff] %v4857_v47 }
 0x168   : > { %v1178_v56 = vadd.f32 %v1177_v22, %v1165_v48 }
 0x16a   : > { %v4859_v59 = vpop.trf.xlu0 }
 0x16b   : > { %v4850_v44 = vpop.trf.xlu1  ;;  %v1166_v18 = vpop.f32.mrf.mxu1  ;;  %5684 = vst [vmem:[#allocation44_spill] sm:$0xff] %v4859_v59 }
 0x16c   : > { %5681 = vst [vmem:[#allocation52_spill] sm:$0xff] %v4850_v44 }
 0x16d   : > { %v1179_v1 = vpop.f32.mrf.mxu2 }
 0x16e   : > { %v1192_v27 = vpop.f32.mrf.mxu3  ;;  %v4863_v28 = vpop.trf.xlu2 }
 0x16f   : > { %v1523_v6 = vpop.f32.mrf.mxu0 }
 0x172   : > { %1813 = vmatmul.bf16.gmra.mxu0 %v4840_v50  ;;  %v4867_v46 = vpop.trf.xlu0 }
 0x173   : > { %1991 = vmatmul.bf16.gmra.mxu2 %v4842_v37  ;;  %2080 = vmatmul.bf16.gmra.mxu3 %v4786_v10  ;;  %v4855_v32 = vpop.trf.xlu1  ;;  %5686 = vst [vmem:[#allocation35_spill] sm:$0xff] %v4867_v46 }
 0x174   : > { %5682 = vst [vmem:[#allocation49_spill] sm:$0xff] %v4855_v32 }
 0x176   : > { %v1549_v51 = vpop.f32.mrf.mxu2  ;;  %v1536_v38 = vpop.f32.mrf.mxu1 }
 0x177   : > { %v1525_v45 = vpop.f32.mrf.mxu0  ;;  %v4877_v21 = vpop.trf.xlu2 }
 0x178   : > { %v1562_v24 = vpop.f32.mrf.mxu3  ;;  %5688 = vst [vmem:[#allocation38_spill] sm:$0xff] %v4877_v21  ;;  %v1524_v45 = vadd.f32 %v1523_v6, %v1139_v19 }
 0x17a   : > { %v4879_v33 = vpop.trf.xlu0 }
 0x17b   : > { %5689 = vst [vmem:[#allocation30_spill] sm:$0xff] %v4879_v33 }
 0x17e   : > { %v1551_v62 = vpop.f32.mrf.mxu2  ;;  %v1538_v4 = vpop.f32.mrf.mxu1 }
 0x17f   : > { %v4887_v1 = vpop.trf.xlu2  ;;  %v1191_v62 = vadd.f32 %v1190_v9, %v1178_v56  ;;  %v1537_v4 = vadd.f32 %v1536_v38, %v1524_v45 }
 0x180   : > { %v1564_v58 = vpop.f32.mrf.mxu3 }
 0x181   : > { %v4861_v0 = vpop.trf.xlu1  ;;  %v1550_v22 = vadd.f32 %v1549_v51, %v1537_v4 }
 0x182   : > { %5685 = vst [vmem:[#allocation41_spill] sm:$0xff] %v4861_v0  ;;  %1818 = vmatmul.bf16.gmra.mxu0 %v4857_v47  ;;  %1882 = vmatmul.bf16.vlgmr.msra.gmra.mxu1 %v4861_v0  ;;  %v4889_v27 = vpop.trf.xlu0 }
 0x183   : > { %1996 = vmatmul.bf16.gmra.mxu2 %v4859_v59  ;;  %2085 = vmatmul.bf16.gmra.mxu3 %v4815_v54  ;;  %v1563_v38 = vadd.f32 %v1562_v24, %v1550_v22 }
 0x187   : > { %v4893_v48 = vpop.trf.xlu2 }
 0x188   : > { %5691 = vst [vmem:[#allocation34_spill] sm:$0xff] %v4893_v48 }
 0x189   : > { %v4872_v5 = vpop.trf.xlu1 }
 0x18a   : > { %5687 = vst [vmem:[#allocation40_spill] sm:$0xff] %v4872_v5 }
 0x18f   : > { %v1575_v18 = vpop.f32.mrf.mxu0 }
 0x190   : > { %v1576_v16 = vadd.f32 %v1575_v18, %v1191_v62 }
 0x191   : > { %v4881_v41 = vpop.trf.xlu1 }
 0x192   : > { %5690 = vst [vmem:[#allocation36_spill] sm:$0xff] %v4881_v41  ;;  %1823 = vmatmul.bf16.gmra.mxu0 %v4877_v21  ;;  %1887 = vmatmul.bf16.gmra.mxu1 %v4881_v41 }
 0x193   : > { %2001 = vmatmul.bf16.gmra.mxu2 %v4879_v33  ;;  %2090 = vmatmul.bf16.gmra.mxu3 %v4835_v43  ;;  %v4895_v33 = vpop.trf.xlu0 }
 0x194   : > { %5692 = vst [vmem:[#allocation28_spill] sm:$0xff] %v4895_v33 }
 0x196   : > { %v1601_v61 = vpop.f32.mrf.mxu2  ;;  %v1588_v41 = vpop.f32.mrf.mxu1 }
 0x197   : > { %v1577_v21 = vpop.f32.mrf.mxu0  ;;  %v1589_v43 = vadd.f32 %v1588_v41, %v1576_v16  ;;  %v769_v41 = vld [vmem:[%s4874_s8] sm:$0xf] }
 0x198   : > { %v1614_v34 = vpop.f32.mrf.mxu3 }
 0x199   : > { %v4891_v58 = vpop.trf.xlu1  ;;  %v1602_v19 = vadd.f32 %v1601_v61, %v1589_v43 }
 0x19b   : > { %v1615_v51 = vadd.f32 %v1614_v34, %v1602_v19 }
 0x19d   : > { %v1620_v21 = vrot.slane %v1615_v51, 6 }
 0x19e   : > { %v1603_v9 = vpop.f32.mrf.mxu2  ;;  %v1590_v56 = vpop.f32.mrf.mxu1 }
 0x19f   : > { %v1621_v18 = vsel %vm604_vm0, %v1563_v38, %v1620_v21 }
 0x1a0   : > { %v1616_v6 = vpop.f32.mrf.mxu3  ;;  %v1623_v45 = vadd.f32 %v1621_v18, %v769_v41 }
 0x1a1   : > { %v4897_v54 = vpop.trf.xlu1 }
 0x1a2   : > { %5693 = vst [vmem:[#allocation31_spill] sm:$0xff] %v4897_v54  ;;  %1828 = vmatmul.bf16.gmra.mxu0 %v4893_v48  ;;  %1892 = vmatmul.bf16.gmra.mxu1 %v4897_v54 }
 0x1a3   : > { %2006 = vmatmul.bf16.gmra.mxu2 %v4895_v33  ;;  %2095 = vmatmul.bf16.gmra.mxu3 %v4850_v44  ;;  %1624 = vst [vmem:[%s4874_s8] sm:$0xf] %v1623_v45 }
 0x1a9   : > { %v4905_v62 = vpop.trf.xlu1 }
 0x1af   : > { %v1794_v43 = vpop.f32.mrf.mxu0 }
 0x1b1   : > { %v4908_v61 = vpop.trf.xlu1 }
 0x1b2   : > { %5694 = vst [vmem:[#allocation57_spill] sm:$0xff] %v4908_v61  ;;  %1833 = vmatmul.bf16.gmra.mxu0 %v4718_v39  ;;  %1897 = vmatmul.bf16.gmra.mxu1 %v4908_v61 }
 0x1b3   : > { %2011 = vmatmul.bf16.gmra.mxu2 %v4735_v53  ;;  %2100 = vmatmul.bf16.gmra.mxu3 %v4679_v29 }
 0x1b6   : > { %v1972_v24 = vpop.f32.mrf.mxu2  ;;  %v2061_v34 = vpop.f32.mrf.mxu3 }
 0x1b7   : > { %v4914_v4 = vpop.f32.mrf.mxu0 }
 0x1b9   : > { %v4916_v16 = vpop.trf.xlu1 }
 0x1be   : > { %v4918_v22 = vpop.f32.mrf.mxu2  ;;  %v4920_v19 = vpop.f32.mrf.mxu3 }
 0x1bf   : > { %v4922_v9 = vpop.f32.mrf.mxu0 }
 0x1c1   : > { %v4924_v6 = vpop.trf.xlu1 }
 0x1c2   : > { %5695 = vst [vmem:[#allocation63_spill] sm:$0xff] %v4924_v6  ;;  %1838 = vmatmul.bf16.gmra.mxu0 %v4757_v30  ;;  %1902 = vmatmul.bf16.gmra.mxu1 %v4924_v6 }
 0x1c3   : > { %2016 = vmatmul.bf16.gmra.mxu2 %v4768_v52  ;;  %2105 = vmatmul.bf16.gmra.mxu3 %v4710_v23 }
 0x1c6   : > { %v4930_v38 = vpop.f32.mrf.mxu2  ;;  %v4932_v51 = vpop.f32.mrf.mxu3 }
 0x1c7   : > { %v4934_v21 = vpop.f32.mrf.mxu0 }
 0x1c9   : > { %v4936_v41 = vpop.trf.xlu1 }
 0x1ce   : > { %v4938_v56 = vpop.f32.mrf.mxu2  ;;  %v4940_v18 = vpop.f32.mrf.mxu3 }
 0x1cf   : > { %v4942_v45 = vpop.f32.mrf.mxu0 }
 0x1d1   : > { %v4944_v30 = vpop.trf.xlu1 }
 0x1d2   : > { %5696 = vst [vmem:[#allocation64_spill] sm:$0xff] %v4944_v30  ;;  %1843 = vmatmul.bf16.gmra.mxu0 %v4799_v20  ;;  %1907 = vmatmul.bf16.gmra.mxu1 %v4944_v30 }
 0x1d3   : > { %2021 = vmatmul.bf16.gmra.mxu2 %v4801_v8  ;;  %2110 = vmatmul.bf16.gmra.mxu3 %v4739_v55 }
 0x1d6   : > { %v4950_v23 = vpop.f32.mrf.mxu2  ;;  %v4952_v52 = vpop.f32.mrf.mxu3 }
 0x1d7   : > { %v4954_v6 = vpop.f32.mrf.mxu0 }
 0x1d9   : > { %v4956_v29 = vpop.trf.xlu1 }
 0x1de   : > { %v4958_v53 = vpop.f32.mrf.mxu2  ;;  %v4960_v61 = vpop.f32.mrf.mxu3 }
 0x1df   : > { %v4962_v39 = vpop.f32.mrf.mxu0 }
 0x1e1   : > { %v4964_v20 = vpop.trf.xlu1 }
 0x1e2   : > { %5697 = vst [vmem:[#allocation65_spill] sm:$0xff] %v4964_v20  ;;  %1848 = vmatmul.bf16.gmra.mxu0 %v4831_v7  ;;  %1912 = vmatmul.bf16.gmra.mxu1 %v4964_v20 }
 0x1e3   : > { %2026 = vmatmul.bf16.gmra.mxu2 %v4833_v35  ;;  %2115 = vmatmul.bf16.gmra.mxu3 %v4772_v26 }
 0x1e6   : > { %v4970_v55 = vpop.f32.mrf.mxu2  ;;  %v4972_v8 = vpop.f32.mrf.mxu3 }
 0x1e7   : > { %v4974_v30 = vpop.f32.mrf.mxu0 }
 0x1e9   : > { %v4976_v44 = vpop.trf.xlu1 }
 0x1ee   : > { %v4978_v33 = vpop.f32.mrf.mxu2  ;;  %v4980_v54 = vpop.f32.mrf.mxu3 }
 0x1ef   : > { %v4982_v48 = vpop.f32.mrf.mxu0 }
 0x1f1   : > { %v4984_v7 = vpop.trf.xlu1 }
 0x1f2   : > { %5698 = vst [vmem:[#allocation66_spill] sm:$0xff] %v4984_v7  ;;  %1853 = vmatmul.bf16.gmra.mxu0 %v4846_v13  ;;  %1917 = vmatmul.bf16.gmra.mxu1 %v4984_v7 }
 0x1f3   : > { %2031 = vmatmul.bf16.gmra.mxu2 %v4848_v11  ;;  %2120 = vmatmul.bf16.gmra.mxu3 %v4805_v57 }
 0x1f6   : > { %v4990_v26 = vpop.f32.mrf.mxu2  ;;  %v4992_v35 = vpop.f32.mrf.mxu3 }
 0x1f7   : > { %v4994_v20 = vpop.f32.mrf.mxu0 }
 0x1fe   : > { %v4996_v59 = vpop.f32.mrf.mxu2  ;;  %v4998_v0 = vpop.f32.mrf.mxu3 }
 0x1ff   : > { %v5000_v47 = vpop.f32.mrf.mxu0  ;;  %v1883_v13 = vpop.f32.mrf.mxu1 }
 0x200   : > { %v1884_v10 = vadd.f32 %v1883_v13, %v1794_v43 }
 0x202   : > { %v1973_v7 = vadd.f32 %v1972_v24, %v1884_v10  ;;  %1858 = vmatmul.bf16.gmra.mxu0 %v4863_v28  ;;  %1922 = vmatmul.bf16.gmra.mxu1 %v4872_v5 }
 0x203   : > { %2036 = vmatmul.bf16.gmra.mxu2 %v4867_v46  ;;  %2125 = vmatmul.bf16.gmra.mxu3 %v4828_v15 }
 0x204   : > { %v2062_v57 = vadd.f32 %v2061_v34, %v1973_v7 }
 0x206   : > { %v5006_v11 = vpop.f32.mrf.mxu2  ;;  %v5008_v37 = vpop.f32.mrf.mxu3  ;;  %2561 = vst [vmem:[%s5013_s1] sm:$0xff] %v2062_v57 }
 0x207   : > { %v5010_v50 = vpop.f32.mrf.mxu0  ;;  %v1885_v25 = vpop.f32.mrf.mxu1 }
 0x208   : > { %v1886_v10 = vadd.f32 %v1885_v25, %v4914_v4 }
 0x20a   : > { %v1975_v13 = vadd.f32 %v4918_v22, %v1886_v10 }
 0x20c   : > { %v2064_v43 = vadd.f32 %v4920_v19, %v1975_v13 }
 0x20e   : > { %v5019_v24 = vpop.f32.mrf.mxu2  ;;  %v5021_v7 = vpop.f32.mrf.mxu3  ;;  %2563 = vst [vmem:[%s5013_s1 + $0x10] sm:$0xff] %v2064_v43 }
 0x20f   : > { %v5023_v34 = vpop.f32.mrf.mxu0  ;;  %v1888_v15 = vpop.f32.mrf.mxu1 }
 0x210   : > { %v1889_v46 = vadd.f32 %v1888_v15, %v4922_v9 }
 0x212   : > { %v1978_v5 = vadd.f32 %v4930_v38, %v1889_v46  ;;  %1863 = vmatmul.bf16.gmra.mxu0 %v4887_v1  ;;  %1927 = vmatmul.bf16.gmra.mxu1 %v4891_v58  ;;  %v5043_v38 = vpop.trf.xlu2 }
 0x213   : > { %2041 = vmatmul.bf16.gmra.mxu2 %v4889_v27  ;;  %2130 = vmatmul.bf16.gmra.mxu3 %v4844_v60 }
 0x214   : > { %v2067_v25 = vadd.f32 %v4932_v51, %v1978_v5 }
 0x216   : > { %v5033_v57 = vpop.f32.mrf.mxu2  ;;  %v5035_v4 = vpop.f32.mrf.mxu3  ;;  %2565 = vst [vmem:[%s5013_s1 + $0x20] sm:$0xff] %v2067_v25 }
 0x217   : > { %v5037_v22 = vpop.f32.mrf.mxu0  ;;  %v1890_v15 = vpop.f32.mrf.mxu1 }
 0x218   : > { %v1891_v46 = vadd.f32 %v1890_v15, %v4934_v21  ;;  %v5053_v25 = vpop.trf.xlu0 }
 0x219   : > { %5699 = vst [vmem:[#allocation67_spill] sm:$0xff] %v5053_v25 }
 0x21a   : > { %v1980_v19 = vadd.f32 %v4938_v56, %v1891_v46 }
 0x21c   : > { %v2069_v9 = vadd.f32 %v4940_v18, %v1980_v19 }
 0x21e   : > { %v5045_v10 = vpop.f32.mrf.mxu2  ;;  %v5047_v13 = vpop.f32.mrf.mxu3  ;;  %2567 = vst [vmem:[%s5013_s1 + $0x30] sm:$0xff] %v2069_v9 }
 0x21f   : > { %v5049_v5 = vpop.f32.mrf.mxu0  ;;  %v1893_v51 = vpop.f32.mrf.mxu1 }
 0x220   : > { %v1894_v43 = vadd.f32 %v1893_v51, %v4942_v45 }
 0x222   : > { %v1983_v21 = vadd.f32 %v4950_v23, %v1894_v43  ;;  %1868 = vmatmul.bf16.gmra.mxu0 %v5043_v38  ;;  %1932 = vmatmul.bf16.gmra.mxu1 %v4905_v62 }
 0x223   : > { %2046 = vmatmul.bf16.gmra.mxu2 %v5053_v25  ;;  %2135 = vmatmul.bf16.gmra.mxu3 %v4855_v32 }
 0x224   : > { %v2072_v56 = vadd.f32 %v4952_v52, %v1983_v21 }
 0x226   : > { %v5061_v18 = vpop.f32.mrf.mxu2  ;;  %v5063_v15 = vpop.f32.mrf.mxu3  ;;  %2569 = vst [vmem:[%s5013_s1 + $0x40] sm:$0xff] %v2072_v56 }
 0x227   : > { %v5065_v45 = vpop.f32.mrf.mxu0  ;;  %v1895_v46 = vpop.f32.mrf.mxu1 }
 0x228   : > { %v1896_v23 = vadd.f32 %v1895_v46, %v4954_v6 }
 0x22a   : > { %v1985_v19 = vadd.f32 %v4958_v53, %v1896_v23 }
 0x22c   : > { %v2074_v9 = vadd.f32 %v4960_v61, %v1985_v19 }
 0x22e   : > { %v5071_v51 = vpop.f32.mrf.mxu2  ;;  %v5073_v43 = vpop.f32.mrf.mxu3  ;;  %2571 = vst [vmem:[%s5013_s1 + $0x50] sm:$0xff] %v2074_v9 }
 0x22f   : > { %v5075_v52 = vpop.f32.mrf.mxu0  ;;  %v1898_v21 = vpop.f32.mrf.mxu1 }
 0x230   : > { %v1899_v32 = vadd.f32 %v1898_v21, %v4962_v39 }
 0x232   : > { %v1988_v25 = vadd.f32 %v4970_v55, %v1899_v32  ;;  %2149 = vmatmul.bf16.vlgmr.msrb.gmra.mxu0 %v4699_v31  ;;  %1937 = vmatmul.bf16.gmra.mxu1 %v4916_v16 }
 0x233   : > { %2327 = vmatmul.bf16.vlgmr.msrb.gmra.mxu2 %v4720_v40  ;;  %2416 = vmatmul.bf16.vlgmr.msrb.gmra.mxu3 %v4658_v42 }
 0x234   : > { %v2077_v53 = vadd.f32 %v4972_v8, %v1988_v25 }
 0x236   : > { %v5085_v61 = vpop.f32.mrf.mxu2  ;;  %v5087_v6 = vpop.f32.mrf.mxu3  ;;  %2573 = vst [vmem:[%s5013_s1 + $0x60] sm:$0xff] %v2077_v53 }
 0x237   : > { %v5089_v56 = vpop.f32.mrf.mxu0  ;;  %v1900_v39 = vpop.f32.mrf.mxu1 }
 0x238   : > { %v1901_v55 = vadd.f32 %v1900_v39, %v4974_v30 }
 0x23a   : > { %v1990_v31 = vadd.f32 %v4978_v33, %v1901_v55 }
 0x23c   : > { %v2079_v32 = vadd.f32 %v4980_v54, %v1990_v31 }
 0x23e   : > { %v5095_v46 = vpop.f32.mrf.mxu2  ;;  %v5097_v42 = vpop.f32.mrf.mxu3  ;;  %2575 = vst [vmem:[%s5013_s1 + $0x70] sm:$0xff] %v2079_v32 }
 0x23f   : > { %v5099_v40 = vpop.f32.mrf.mxu0  ;;  %v1903_v8 = vpop.f32.mrf.mxu1 }
 0x240   : > { %v1904_v25 = vadd.f32 %v1903_v8, %v4982_v48 }
 0x242   : > { %v1993_v23 = vadd.f32 %v4990_v26, %v1904_v25  ;;  %2154 = vmatmul.bf16.gmra.mxu0 %v4741_v63  ;;  %1942 = vmatmul.bf16.gmra.mxu1 %v4936_v41 }
 0x243   : > { %2332 = vmatmul.bf16.gmra.mxu2 %v4749_v17  ;;  %2421 = vmatmul.bf16.gmra.mxu3 %v4694_v14 }
 0x244   : > { %v2082_v30 = vadd.f32 %v4992_v35, %v1993_v23 }
 0x246   : > { %v5109_v54 = vpop.f32.mrf.mxu2  ;;  %v5111_v33 = vpop.f32.mrf.mxu3  ;;  %2577 = vst [vmem:[%s5013_s1 + $0x80] sm:$0xff] %v2082_v30 }
 0x247   : > { %v5113_v19 = vpop.f32.mrf.mxu0  ;;  %v1905_v48 = vpop.f32.mrf.mxu1 }
 0x248   : > { %v1906_v26 = vadd.f32 %v1905_v48, %v4994_v20 }
 0x24a   : > { %v1995_v63 = vadd.f32 %v4996_v59, %v1906_v26 }
 0x24c   : > { %v2084_v9 = vadd.f32 %v4998_v0, %v1995_v63  ;;  %v5171_v63 = vpop.trf.xlu1 }
 0x24e   : > { %v5119_v21 = vpop.f32.mrf.mxu2  ;;  %v5121_v14 = vpop.f32.mrf.mxu3  ;;  %2579 = vst [vmem:[%s5013_s1 + $0x90] sm:$0xff] %v2084_v9 }
 0x24f   : > { %v5123_v17 = vpop.f32.mrf.mxu0  ;;  %v1908_v35 = vpop.f32.mrf.mxu1 }
 0x250   : > { %v1909_v53 = vadd.f32 %v1908_v35, %v5000_v47 }
 0x252   : > { %v1998_v39 = vadd.f32 %v5006_v11, %v1909_v53  ;;  %2159 = vmatmul.bf16.gmra.mxu0 %v4778_v36  ;;  %1947 = vmatmul.bf16.gmra.mxu1 %v4956_v29 }
 0x253   : > { %2337 = vmatmul.bf16.gmra.mxu2 %v4783_v2  ;;  %2426 = vmatmul.bf16.gmra.mxu3 %v4724_v49 }
 0x254   : > { %v2087_v20 = vadd.f32 %v5008_v37, %v1998_v39 }
 0x256   : > { %v5133_v59 = vpop.f32.mrf.mxu2  ;;  %v5135_v0 = vpop.f32.mrf.mxu3  ;;  %2581 = vst [vmem:[%s5013_s1 + $0xa0] sm:$0xff] %v2087_v20 }
 0x257   : > { %v5137_v55 = vpop.f32.mrf.mxu0  ;;  %v1910_v47 = vpop.f32.mrf.mxu1 }
 0x258   : > { %v1911_v11 = vadd.f32 %v1910_v47, %v5010_v50  ;;  %v5700_v50 = vld [vmem:[#allocation37_spill] sm:$0xff] }
 0x25a   : > { %v2000_v36 = vadd.f32 %v5019_v24, %v1911_v11 }
 0x25c   : > { %v2089_v31 = vadd.f32 %v5021_v7, %v2000_v36 }
 0x25e   : > { %v5143_v32 = vpop.f32.mrf.mxu2  ;;  %v5145_v49 = vpop.f32.mrf.mxu3  ;;  %2583 = vst [vmem:[%s5013_s1 + $0xb0] sm:$0xff] %v2089_v31 }
 0x25f   : > { %v5147_v2 = vpop.f32.mrf.mxu0  ;;  %v1913_v37 = vpop.f32.mrf.mxu1 }
 0x260   : > { %v1914_v8 = vadd.f32 %v1913_v37, %v5023_v34 }
 0x262   : > { %v2003_v25 = vadd.f32 %v5033_v57, %v1914_v8  ;;  %2164 = vmatmul.bf16.gmra.mxu0 %v4817_v12  ;;  %1952 = vmatmul.bf16.gmra.mxu1 %v4976_v44 }
 0x263   : > { %2342 = vmatmul.bf16.gmra.mxu2 %v4819_v3  ;;  %2431 = vmatmul.bf16.gmra.mxu3 %v5700_v50 }
 0x264   : > { %v2092_v24 = vadd.f32 %v5035_v4, %v2003_v25 }
 0x266   : > { %v5157_v7 = vpop.f32.mrf.mxu2  ;;  %v5159_v23 = vpop.f32.mrf.mxu3  ;;  %2585 = vst [vmem:[%s5013_s1 + $0xc0] sm:$0xff] %v2092_v24  ;;  %v5704_v24 = vld [vmem:[#allocation39_spill] sm:$0xff] }
 0x267   : > { %v5161_v30 = vpop.f32.mrf.mxu0  ;;  %v1915_v34 = vpop.f32.mrf.mxu1 }
 0x268   : > { %v1916_v57 = vadd.f32 %v1915_v34, %v5037_v22  ;;  %v5701_v22 = vld [vmem:[#allocation48_spill] sm:$0xff]  ;;  %v5707_v34 = vld [vmem:[#allocation45_spill] sm:$0xff] }
 0x26a   : > { %v2005_v12 = vadd.f32 %v5045_v10, %v1916_v57  ;;  %v5702_v10 = vld [vmem:[#allocation50_spill] sm:$0xff] }
 0x26c   : > { %v2094_v48 = vadd.f32 %v5047_v13, %v2005_v12  ;;  %v5703_v13 = vld [vmem:[#allocation27_spill] sm:$0xff] }
 0x26e   : > { %v5167_v26 = vpop.f32.mrf.mxu2  ;;  %v5169_v3 = vpop.f32.mrf.mxu3  ;;  %2587 = vst [vmem:[%s5013_s1 + $0xd0] sm:$0xff] %v2094_v48 }
 0x26f   : > { %v1918_v4 = vpop.f32.mrf.mxu1  ;;  %v5175_v35 = vpop.f32.mrf.mxu0 }
 0x270   : > { %v1919_v9 = vadd.f32 %v1918_v4, %v5049_v5 }
 0x272   : > { %v2008_v53 = vadd.f32 %v5061_v18, %v1919_v9  ;;  %2169 = vmatmul.bf16.gmra.mxu0 %v5701_v22  ;;  %1957 = vmatmul.bf16.gmra.mxu1 %v5171_v63 }
 0x273   : > { %2347 = vmatmul.bf16.gmra.mxu2 %v5702_v10  ;;  %2436 = vmatmul.bf16.gmra.mxu3 %v5703_v13 }
 0x274   : > { %v2097_v39 = vadd.f32 %v5063_v15, %v2008_v53 }
 0x276   : > { %v5183_v20 = vpop.f32.mrf.mxu2  ;;  %v5185_v47 = vpop.f32.mrf.mxu3  ;;  %2589 = vst [vmem:[%s5013_s1 + $0xe0] sm:$0xff] %v2097_v39  ;;  %v5708_v39 = vld [vmem:[#allocation38_spill] sm:$0xff] }
 0x277   : > { %v1920_v5 = vpop.f32.mrf.mxu1  ;;  %v5190_v36 = vpop.f32.mrf.mxu0 }
 0x278   : > { %v1921_v11 = vadd.f32 %v1920_v5, %v5065_v45  ;;  %v5705_v45 = vld [vmem:[#allocation41_spill] sm:$0xff] }
 0x27a   : > { %v2010_v18 = vadd.f32 %v5071_v51, %v1921_v11  ;;  %v5706_v51 = vld [vmem:[#allocation44_spill] sm:$0xff] }
 0x27c   : > { %v2099_v31 = vadd.f32 %v5073_v43, %v2010_v18 }
 0x27e   : > { %v5193_v37 = vpop.f32.mrf.mxu2  ;;  %v5195_v8 = vpop.f32.mrf.mxu3  ;;  %2591 = vst [vmem:[%s5013_s1 + $0xf0] sm:$0xff] %v2099_v31 }
 0x27f   : > { %v1923_v15 = vpop.f32.mrf.mxu1  ;;  %v5205_v57 = vpop.f32.mrf.mxu0 }
 0x280   : > { %v1924_v25 = vadd.f32 %v1923_v15, %v5075_v52 }
 0x282   : > { %v2013_v50 = vadd.f32 %v5085_v61, %v1924_v25  ;;  %2174 = vmatmul.bf16.gmra.mxu0 %v5704_v24  ;;  %2238 = vmatmul.bf16.vlgmr.msrb.gmra.mxu1 %v5705_v45 }
 0x283   : > { %2352 = vmatmul.bf16.gmra.mxu2 %v5706_v51  ;;  %2441 = vmatmul.bf16.gmra.mxu3 %v5707_v34  ;;  %v5712_v51 = vld [vmem:[#allocation34_spill] sm:$0xff] }
 0x284   : > { %v2102_v43 = vadd.f32 %v5087_v6, %v2013_v50 }
 0x286   : > { %v5207_v12 = vpop.f32.mrf.mxu2  ;;  %2593 = vst [vmem:[%s5013_s1 + $0x100] sm:$0xff] %v2102_v43  ;;  %v5211_v61 = vpop.f32.mrf.mxu3  ;;  %v5715_v43 = vld [vmem:[#allocation52_spill] sm:$0xff] }
 0x287   : > { %v1925_v48 = vpop.f32.mrf.mxu1  ;;  %v5215_v53 = vpop.f32.mrf.mxu0 }
 0x288   : > { %v1926_v52 = vadd.f32 %v1925_v48, %v5089_v56  ;;  %v5709_v56 = vld [vmem:[#allocation36_spill] sm:$0xff] }
 0x28a   : > { %v2015_v4 = vadd.f32 %v5095_v46, %v1926_v52  ;;  %v5710_v46 = vld [vmem:[#allocation30_spill] sm:$0xff] }
 0x28c   : > { %v2104_v9 = vadd.f32 %v5097_v42, %v2015_v4  ;;  %v5711_v42 = vld [vmem:[#allocation55_spill] sm:$0xff] }
 0x28e   : > { %2595 = vst [vmem:[%s5013_s1 + $0x110] sm:$0xff] %v2104_v9  ;;  %v5219_v10 = vpop.f32.mrf.mxu2  ;;  %v5224_v5 = vpop.f32.mrf.mxu3 }
 0x28f   : > { %v1928_v22 = vpop.f32.mrf.mxu1  ;;  %v5231_v31 = vpop.f32.mrf.mxu0 }
 0x290   : > { %v1929_v6 = vadd.f32 %v1928_v22, %v5099_v40 }
 0x292   : > { %v2018_v13 = vadd.f32 %v5109_v54, %v1929_v6  ;;  %2179 = vmatmul.bf16.gmra.mxu0 %v5708_v39  ;;  %2243 = vmatmul.bf16.gmra.mxu1 %v5709_v56 }
 0x293   : > { %2357 = vmatmul.bf16.gmra.mxu2 %v5710_v46  ;;  %2446 = vmatmul.bf16.gmra.mxu3 %v5711_v42  ;;  %v5716_v46 = vld [vmem:[#allocation60_spill] sm:$0xff] }
 0x294   : > { %v2107_v11 = vadd.f32 %v5111_v33, %v2018_v13 }
 0x296   : > { %2597 = vst [vmem:[%s5013_s1 + $0x120] sm:$0xff] %v2107_v11  ;;  %v5234_v15 = vpop.f32.mrf.mxu2  ;;  %v5237_v50 = vpop.f32.mrf.mxu3 }
 0x297   : > { %v1930_v18 = vpop.f32.mrf.mxu1  ;;  %v5244_v34 = vpop.f32.mrf.mxu0 }
 0x298   : > { %v1931_v40 = vadd.f32 %v1930_v18, %v5113_v19  ;;  %v5713_v19 = vld [vmem:[#allocation31_spill] sm:$0xff] }
 0x29a   : > { %v2020_v54 = vadd.f32 %v5119_v21, %v1931_v40  ;;  %v5714_v21 = vld [vmem:[#allocation28_spill] sm:$0xff] }
 0x29c   : > { %v2109_v25 = vadd.f32 %v5121_v14, %v2020_v54 }
 0x29e   : > { %2599 = vst [vmem:[%s5013_s1 + $0x130] sm:$0xff] %v2109_v25  ;;  %v5249_v48 = vpop.f32.mrf.mxu2  ;;  %v5251_v52 = vpop.f32.mrf.mxu3 }
 0x29f   : > { %v1933_v24 = vpop.f32.mrf.mxu1  ;;  %v5257_v22 = vpop.f32.mrf.mxu0 }
 0x2a0   : > { %v1934_v45 = vadd.f32 %v1933_v24, %v5123_v17 }
 0x2a2   : > { %v2023_v33 = vadd.f32 %v5133_v59, %v1934_v45  ;;  %2184 = vmatmul.bf16.gmra.mxu0 %v5712_v51  ;;  %2248 = vmatmul.bf16.gmra.mxu1 %v5713_v19  ;;  %v5720_v51 = vld [vmem:[#allocation29_spill] sm:$0xff] }
 0x2a3   : > { %2362 = vmatmul.bf16.gmra.mxu2 %v5714_v21  ;;  %2451 = vmatmul.bf16.gmra.mxu3 %v5715_v43  ;;  %v5723_v21 = vld [vmem:[#allocation59_spill] sm:$0xff] }
 0x2a4   : > { %v2112_v14 = vadd.f32 %v5135_v0, %v2023_v33 }
 0x2a6   : > { %2601 = vst [vmem:[%s5013_s1 + $0x140] sm:$0xff] %v2112_v14  ;;  %v5259_v6 = vpop.f32.mrf.mxu2  ;;  %v5263_v39 = vpop.f32.mrf.mxu3 }
 0x2a7   : > { %v1935_v17 = vpop.f32.mrf.mxu1  ;;  %v5271_v11 = vpop.f32.mrf.mxu0 }
 0x2a8   : > { %v1936_v59 = vadd.f32 %v1935_v17, %v5137_v55  ;;  %v5717_v55 = vld [vmem:[#allocation57_spill] sm:$0xff] }
 0x2aa   : > { %v2025_v4 = vadd.f32 %v5143_v32, %v1936_v59  ;;  %v5718_v32 = vld [vmem:[#allocation61_spill] sm:$0xff] }
 0x2ac   : > { %v2114_v9 = vadd.f32 %v5145_v49, %v2025_v4  ;;  %v5719_v49 = vld [vmem:[#allocation58_spill] sm:$0xff] }
 0x2ae   : > { %2603 = vst [vmem:[%s5013_s1 + $0x150] sm:$0xff] %v2114_v9  ;;  %v5275_v40 = vpop.f32.mrf.mxu2  ;;  %v5278_v54 = vpop.f32.mrf.mxu3 }
 0x2af   : > { %v1938_v13 = vpop.f32.mrf.mxu1 }
 0x2b0   : > { %v1939_v0 = vadd.f32 %v1938_v13, %v5147_v2 }
 0x2b2   : > { %v2028_v56 = vadd.f32 %v5157_v7, %v1939_v0  ;;  %2189 = vmatmul.bf16.gmra.mxu0 %v5716_v46  ;;  %2253 = vmatmul.bf16.gmra.mxu1 %v5717_v55  ;;  %v5727_v46 = vld [vmem:[#allocation62_spill] sm:$0xff] }
 0x2b3   : > { %2367 = vmatmul.bf16.gmra.mxu2 %v5718_v32  ;;  %2456 = vmatmul.bf16.gmra.mxu3 %v5719_v49 }
 0x2b4   : > { %v2117_v42 = vadd.f32 %v5159_v23, %v2028_v56  ;;  %v5283_v23 = vpop.f32.mrf.mxu0  ;;  %v5724_v56 = vld [vmem:[#allocation43_spill] sm:$0xff] }
 0x2b6   : > { %2605 = vst [vmem:[%s5013_s1 + $0x160] sm:$0xff] %v2117_v42  ;;  %v5288_v19 = vpop.f32.mrf.mxu2  ;;  %v5293_v43 = vpop.f32.mrf.mxu3 }
 0x2b7   : > { %v1940_v18 = vpop.f32.mrf.mxu1 }
 0x2b8   : > { %v1941_v2 = vadd.f32 %v1940_v18, %v5161_v30  ;;  %v5721_v30 = vld [vmem:[#allocation63_spill] sm:$0xff] }
 0x2ba   : > { %v2030_v7 = vadd.f32 %v5167_v26, %v1941_v2  ;;  %v5722_v26 = vld [vmem:[#allocation32_spill] sm:$0xff] }
 0x2bc   : > { %v2119_v25 = vadd.f32 %v5169_v3, %v2030_v7  ;;  %v5298_v17 = vpop.f32.mrf.mxu0 }
 0x2be   : > { %2607 = vst [vmem:[%s5013_s1 + $0x170] sm:$0xff] %v2119_v25  ;;  %v5301_v4 = vpop.f32.mrf.mxu2  ;;  %v5303_v9 = vpop.f32.mrf.mxu3 }
 0x2bf   : > { %v1943_v24 = vpop.f32.mrf.mxu1 }
 0x2c0   : > { %v1944_v45 = vadd.f32 %v1943_v24, %v5175_v35 }
 0x2c2   : > { %v2033_v33 = vadd.f32 %v5183_v20, %v1944_v45  ;;  %2194 = vmatmul.bf16.gmra.mxu0 %v5720_v51  ;;  %2258 = vmatmul.bf16.gmra.mxu1 %v5721_v30  ;;  %v5728_v45 = vld [vmem:[#allocation54_spill] sm:$0xff] }
 0x2c3   : > { %2372 = vmatmul.bf16.gmra.mxu2 %v5722_v26  ;;  %2461 = vmatmul.bf16.gmra.mxu3 %v5723_v21 }
 0x2c4   : > { %v2122_v3 = vadd.f32 %v5185_v47, %v2033_v33  ;;  %v5313_v55 = vpop.f32.mrf.mxu0 }
 0x2c6   : > { %2609 = vst [vmem:[%s5013_s1 + $0x180] sm:$0xff] %v2122_v3  ;;  %v5315_v32 = vpop.f32.mrf.mxu2 }
 0x2c7   : > { %v1945_v35 = vpop.f32.mrf.mxu1 }
 0x2c8   : > { %v1946_v14 = vadd.f32 %v1945_v35, %v5190_v36  ;;  %v5725_v36 = vld [vmem:[#allocation64_spill] sm:$0xff] }
 0x2ca   : > { %v2035_v20 = vadd.f32 %v5193_v37, %v1946_v14  ;;  %v5726_v37 = vld [vmem:[#allocation56_spill] sm:$0xff] }
 0x2cc   : > { %v2124_v59 = vadd.f32 %v5195_v8, %v2035_v20  ;;  %v5323_v2 = vpop.f32.mrf.mxu0 }
 0x2ce   : > { %2611 = vst [vmem:[%s5013_s1 + $0x190] sm:$0xff] %v2124_v59  ;;  %v5327_v25 = vpop.f32.mrf.mxu2  ;;  %v5732_v59 = vld [vmem:[#allocation53_spill] sm:$0xff] }
 0x2cf   : > { %v1948_v13 = vpop.f32.mrf.mxu1 }
 0x2d0   : > { %v1949_v47 = vadd.f32 %v1948_v13, %v5205_v57 }
 0x2d2   : > { %v2038_v0 = vadd.f32 %v5207_v12, %v1949_v47  ;;  %2199 = vmatmul.bf16.gmra.mxu0 %v5724_v56  ;;  %2263 = vmatmul.bf16.gmra.mxu1 %v5725_v36  ;;  %v5319_v12 = vpop.f32.mrf.mxu3  ;;  %v5735_v47 = vld [vmem:[#allocation47_spill] sm:$0xff] }
 0x2d3   : > { %2377 = vmatmul.bf16.gmra.mxu2 %v5726_v37  ;;  %2466 = vmatmul.bf16.gmra.mxu3 %v5727_v46 }
 0x2d4   : > { %v2127_v8 = vadd.f32 %v5211_v61, %v2038_v0  ;;  %v5339_v26 = vpop.f32.mrf.mxu0 }
 0x2d6   : > { %2613 = vst [vmem:[%s5013_s1 + $0x1a0] sm:$0xff] %v2127_v8  ;;  %v5342_v21 = vpop.f32.mrf.mxu2 }
 0x2d7   : > { %v1950_v49 = vpop.f32.mrf.mxu1 }
 0x2d8   : > { %v1951_v57 = vadd.f32 %v1950_v49, %v5215_v53  ;;  %v5729_v53 = vld [vmem:[#allocation65_spill] sm:$0xff] }
 0x2da   : > { %v2040_v42 = vadd.f32 %v5219_v10, %v1951_v57  ;;  %v5332_v33 = vpop.f32.mrf.mxu3  ;;  %v5730_v10 = vld [vmem:[#allocation51_spill] sm:$0xff] }
 0x2dc   : > { %v2129_v18 = vadd.f32 %v5224_v5, %v2040_v42  ;;  %v5731_v5 = vld [vmem:[#allocation33_spill] sm:$0xff]  ;;  %v5352_v13 = vpop.f32.mrf.mxu0 }
 0x2de   : > { %2615 = vst [vmem:[%s5013_s1 + $0x1b0] sm:$0xff] %v2129_v18  ;;  %v2340_v0 = vpop.f32.mrf.mxu2  ;;  %v5736_v18 = vld [vmem:[#allocation40_spill] sm:$0xff] }
 0x2df   : > { %v1953_v7 = vpop.f32.mrf.mxu1 }
 0x2e0   : > { %v1954_v61 = vadd.f32 %v1953_v7, %v5231_v31 }
 0x2e2   : > { %v2043_v24 = vadd.f32 %v5234_v15, %v1954_v61  ;;  %2204 = vmatmul.bf16.gmra.mxu0 %v5728_v45  ;;  %2268 = vmatmul.bf16.gmra.mxu1 %v5729_v53  ;;  %v5345_v35 = vpop.f32.mrf.mxu3 }
 0x2e3   : > { %2382 = vmatmul.bf16.gmra.mxu2 %v5730_v10  ;;  %2471 = vmatmul.bf16.gmra.mxu3 %v5731_v5 }
 0x2e4   : > { %v2132_v51 = vadd.f32 %v5237_v50, %v2043_v24  ;;  %v2165_v46 = vpop.f32.mrf.mxu0 }
 0x2e6   : > { %2617 = vst [vmem:[%s5013_s1 + $0x1c0] sm:$0xff] %v2132_v51  ;;  %v2343_v8 = vpop.f32.mrf.mxu2 }
 0x2e7   : > { %v1955_v30 = vpop.f32.mrf.mxu1 }
 0x2e8   : > { %v1956_v31 = vadd.f32 %v1955_v30, %v5244_v34  ;;  %v5733_v34 = vld [vmem:[#allocation66_spill] sm:$0xff] }
 0x2ea   : > { %v2045_v15 = vadd.f32 %v5249_v48, %v1956_v31  ;;  %v5734_v48 = vld [vmem:[#allocation42_spill] sm:$0xff]  ;;  %v2429_v56 = vpop.f32.mrf.mxu3 }
 0x2ec   : > { %v2134_v3 = vadd.f32 %v5251_v52, %v2045_v15  ;;  %v2167_v7 = vpop.f32.mrf.mxu0 }
 0x2ee   : > { %2619 = vst [vmem:[%s5013_s1 + $0x1d0] sm:$0xff] %v2134_v3 }
 0x2ef   : > { %v1958_v14 = vpop.f32.mrf.mxu1 }
 0x2f0   : > { %v1959_v20 = vadd.f32 %v1958_v14, %v5257_v22 }
 0x2f2   : > { %v2048_v50 = vadd.f32 %v5259_v6, %v1959_v20  ;;  %2209 = vmatmul.bf16.gmra.mxu0 %v5732_v59  ;;  %2273 = vmatmul.bf16.gmra.mxu1 %v5733_v34  ;;  %v2432_v42 = vpop.f32.mrf.mxu3 }
 0x2f3   : > { %2387 = vmatmul.bf16.gmra.mxu2 %v5734_v48  ;;  %2476 = vmatmul.bf16.gmra.mxu3 %v5735_v47 }
 0x2f4   : > { %v2137_v52 = vadd.f32 %v5263_v39, %v2048_v50  ;;  %v2170_v5 = vpop.f32.mrf.mxu0 }
 0x2f6   : > { %2621 = vst [vmem:[%s5013_s1 + $0x1e0] sm:$0xff] %v2137_v52 }
 0x2f7   : > { %v1960_v36 = vpop.f32.mrf.mxu1 }
 0x2f8   : > { %v1961_v22 = vadd.f32 %v1960_v36, %v5271_v11  ;;  %v5737_v11 = vld [vmem:[#allocation35_spill] sm:$0xff] }
 0x2fa   : > { %v2050_v6 = vadd.f32 %v5275_v40, %v1961_v22  ;;  %v5738_v40 = vld [vmem:[#allocation46_spill] sm:$0xff] }
 0x2fc   : > { %v2139_v37 = vadd.f32 %v5278_v54, %v2050_v6 }
 0x2fe   : > { %2623 = vst [vmem:[%s5013_s1 + $0x1f0] sm:$0xff] %v2139_v37 }
 0x2ff   : > { %v2239_v49 = vpop.f32.mrf.mxu1 }
 0x300   : > { %v2240_v57 = vadd.f32 %v2239_v49, %v5283_v23  ;;  %v2345_v23 = vpop.f32.mrf.mxu2 }
 0x302   : > { %v2329_v39 = vadd.f32 %v5288_v19, %v2240_v57  ;;  %2214 = vmatmul.bf16.gmra.mxu0 %v4863_v28  ;;  %2278 = vmatmul.bf16.gmra.mxu1 %v5736_v18  ;;  %v2434_v19 = vpop.f32.mrf.mxu3 }
 0x303   : > { %2392 = vmatmul.bf16.gmra.mxu2 %v5737_v11  ;;  %2481 = vmatmul.bf16.gmra.mxu3 %v5738_v40 }
 0x304   : > { %v2418_v54 = vadd.f32 %v5293_v43, %v2329_v39 }
 0x306   : > { %2562 = vst [vmem:[%s5013_s1 + $0x8] sm:$0xff] %v2418_v54 }
 0x307   : > { %v2241_v61 = vpop.f32.mrf.mxu1 }
 0x308   : > { %v2242_v24 = vadd.f32 %v2241_v61, %v5298_v17  ;;  %v2348_v43 = vpop.f32.mrf.mxu2 }
 0x30a   : > { %v2331_v45 = vadd.f32 %v5301_v4, %v2242_v24  ;;  %v2437_v4 = vpop.f32.mrf.mxu3 }
 0x30c   : > { %v2420_v28 = vadd.f32 %v5303_v9, %v2331_v45 }
 0x30e   : > { %2564 = vst [vmem:[%s5013_s1 + $0x18] sm:$0xff] %v2420_v28 }
 0x30f   : > { %v2244_v53 = vpop.f32.mrf.mxu1 }
 0x310   : > { %v2245_v10 = vadd.f32 %v2244_v53, %v5313_v55  ;;  %v2350_v31 = vpop.f32.mrf.mxu2 }
 0x312   : > { %v2334_v51 = vadd.f32 %v5315_v32, %v2245_v10  ;;  %2219 = vmatmul.bf16.gmra.mxu0 %v4887_v1  ;;  %2283 = vmatmul.bf16.gmra.mxu1 %v4891_v58  ;;  %v2172_v32 = vpop.f32.mrf.mxu0  ;;  %v2439_v58 = vpop.f32.mrf.mxu3 }
 0x313   : > { %2397 = vmatmul.bf16.gmra.mxu2 %v4889_v27  ;;  %2486 = vmatmul.bf16.gmra.mxu3 %v4844_v60 }
 0x314   : > { %v2423_v17 = vadd.f32 %v5319_v12, %v2334_v51  ;;  %v5739_v12 = vld [vmem:[#allocation67_spill] sm:$0xff] }
 0x316   : > { %2566 = vst [vmem:[%s5013_s1 + $0x28] sm:$0xff] %v2423_v17 }
 0x317   : > { %v2246_v9 = vpop.f32.mrf.mxu1 }
 0x318   : > { %v2247_v55 = vadd.f32 %v2246_v9, %v5323_v2  ;;  %v5740_v2 = vld [vmem:[#allocation49_spill] sm:$0xff]  ;;  %v2353_v3 = vpop.f32.mrf.mxu2 }
 0x31a   : > { %v2336_v30 = vadd.f32 %v5327_v25, %v2247_v55  ;;  %v2442_v20 = vpop.f32.mrf.mxu3 }
 0x31c   : > { %v2425_v1 = vadd.f32 %v5332_v33, %v2336_v30  ;;  %v2175_v33 = vpop.f32.mrf.mxu0 }
 0x31e   : > { %2568 = vst [vmem:[%s5013_s1 + $0x38] sm:$0xff] %v2425_v1 }
 0x31f   : > { %v2249_v15 = vpop.f32.mrf.mxu1 }
 0x320   : > { %v2250_v27 = vadd.f32 %v2249_v15, %v5339_v26  ;;  %v2355_v34 = vpop.f32.mrf.mxu2 }
 0x322   : > { %v2339_v60 = vadd.f32 %v5342_v21, %v2250_v27  ;;  %2224 = vmatmul.bf16.gmra.mxu0 %v5043_v38  ;;  %2288 = vmatmul.bf16.gmra.mxu1 %v4905_v62 }
 0x323   : > { %2402 = vmatmul.bf16.gmra.mxu2 %v5739_v12  ;;  %2491 = vmatmul.bf16.gmra.mxu3 %v5740_v2 }
 0x324   : > { %v2428_v25 = vadd.f32 %v5345_v35, %v2339_v60  ;;  %v2177_v59 = vpop.f32.mrf.mxu0  ;;  %v2444_v35 = vpop.f32.mrf.mxu3 }
 0x326   : > { %2570 = vst [vmem:[%s5013_s1 + $0x48] sm:$0xff] %v2428_v25 }
 0x327   : > { %v2251_v14 = vpop.f32.mrf.mxu1 }
 0x328   : > { %v2252_v26 = vadd.f32 %v2251_v14, %v5352_v13  ;;  %v2358_v6 = vpop.f32.mrf.mxu2 }
 0x32a   : > { %v2341_v21 = vadd.f32 %v2340_v0, %v2252_v26 }
 0x32c   : > { %v2430_v50 = vadd.f32 %v2429_v56, %v2341_v21  ;;  %v2180_v22 = vpop.f32.mrf.mxu0  ;;  %v2447_v56 = vpop.f32.mrf.mxu3 }
 0x32e   : > { %2572 = vst [vmem:[%s5013_s1 + $0x58] sm:$0xff] %v2430_v50 }
 0x32f   : > { %v2254_v38 = vpop.f32.mrf.mxu1 }
 0x330   : > { %v2255_v62 = vadd.f32 %v2254_v38, %v2165_v46  ;;  %v2360_v57 = vpop.f32.mrf.mxu2 }
 0x332   : > { %v2344_v48 = vadd.f32 %v2343_v8, %v2255_v62  ;;  %2293 = vmatmul.bf16.gmra.mxu1 %v4916_v16 }
 0x334   : > { %v2433_v47 = vadd.f32 %v2432_v42, %v2344_v48  ;;  %v2182_v8 = vpop.f32.mrf.mxu0  ;;  %v2449_v42 = vpop.f32.mrf.mxu3 }
 0x336   : > { %2574 = vst [vmem:[%s5013_s1 + $0x68] sm:$0xff] %v2433_v47 }
 0x337   : > { %v2256_v52 = vpop.f32.mrf.mxu1 }
 0x338   : > { %v2257_v36 = vadd.f32 %v2256_v52, %v2167_v7  ;;  %v2363_v7 = vpop.f32.mrf.mxu2 }
 0x33a   : > { %v2346_v13 = vadd.f32 %v2345_v23, %v2257_v36 }
 0x33c   : > { %v2435_v0 = vadd.f32 %v2434_v19, %v2346_v13  ;;  %v2185_v54 = vpop.f32.mrf.mxu0  ;;  %v2452_v23 = vpop.f32.mrf.mxu3 }
 0x33e   : > { %2576 = vst [vmem:[%s5013_s1 + $0x78] sm:$0xff] %v2435_v0 }
 0x33f   : > { %v2259_v37 = vpop.f32.mrf.mxu1 }
 0x340   : > { %v2260_v49 = vadd.f32 %v2259_v37, %v2170_v5  ;;  %v2365_v10 = vpop.f32.mrf.mxu2 }
 0x342   : > { %v2349_v46 = vadd.f32 %v2348_v43, %v2260_v49  ;;  %2298 = vmatmul.bf16.gmra.mxu1 %v4936_v41 }
 0x344   : > { %v2438_v16 = vadd.f32 %v2437_v4, %v2349_v46  ;;  %v2187_v19 = vpop.f32.mrf.mxu0  ;;  %v2454_v51 = vpop.f32.mrf.mxu3 }
 0x346   : > { %2578 = vst [vmem:[%s5013_s1 + $0x88] sm:$0xff] %v2438_v16 }
 0x347   : > { %v2261_v39 = vpop.f32.mrf.mxu1 }
 0x348   : > { %v2262_v18 = vadd.f32 %v2261_v39, %v2172_v32  ;;  %v2368_v30 = vpop.f32.mrf.mxu2 }
 0x34a   : > { %v2351_v11 = vadd.f32 %v2350_v31, %v2262_v18 }
 0x34c   : > { %v2440_v40 = vadd.f32 %v2439_v58, %v2351_v11  ;;  %v2190_v9 = vpop.f32.mrf.mxu0  ;;  %v2457_v32 = vpop.f32.mrf.mxu3 }
 0x34e   : > { %2580 = vst [vmem:[%s5013_s1 + $0x98] sm:$0xff] %v2440_v40 }
 0x34f   : > { %v2264_v61 = vpop.f32.mrf.mxu1 }
 0x350   : > { %v2265_v24 = vadd.f32 %v2264_v61, %v2175_v33  ;;  %v2370_v60 = vpop.f32.mrf.mxu2 }
 0x352   : > { %v2354_v45 = vadd.f32 %v2353_v3, %v2265_v24  ;;  %2303 = vmatmul.bf16.gmra.mxu1 %v4956_v29 }
 0x354   : > { %v2443_v41 = vadd.f32 %v2442_v20, %v2354_v45  ;;  %v2192_v15 = vpop.f32.mrf.mxu0  ;;  %v2459_v12 = vpop.f32.mrf.mxu3 }
 0x356   : > { %2582 = vst [vmem:[%s5013_s1 + $0xa8] sm:$0xff] %v2443_v41 }
 0x357   : > { %v2266_v28 = vpop.f32.mrf.mxu1 }
 0x358   : > { %v2267_v53 = vadd.f32 %v2266_v28, %v2177_v59  ;;  %v2373_v14 = vpop.f32.mrf.mxu2 }
 0x35a   : > { %v2356_v5 = vadd.f32 %v2355_v34, %v2267_v53 }
 0x35c   : > { %v2445_v43 = vadd.f32 %v2444_v35, %v2356_v5  ;;  %v2195_v3 = vpop.f32.mrf.mxu0  ;;  %v2462_v21 = vpop.f32.mrf.mxu3 }
 0x35e   : > { %2584 = vst [vmem:[%s5013_s1 + $0xb8] sm:$0xff] %v2445_v43 }
 0x35f   : > { %v2269_v17 = vpop.f32.mrf.mxu1 }
 0x360   : > { %v2270_v4 = vadd.f32 %v2269_v17, %v2180_v22 }
 0x362   : > { %v2359_v55 = vadd.f32 %v2358_v6, %v2270_v4  ;;  %2308 = vmatmul.bf16.gmra.mxu1 %v4976_v44 }
 0x364   : > { %v2448_v29 = vadd.f32 %v2447_v56, %v2359_v55  ;;  %v2197_v38 = vpop.f32.mrf.mxu0  ;;  %v2464_v35 = vpop.f32.mrf.mxu3 }
 0x366   : > { %2586 = vst [vmem:[%s5013_s1 + $0xc8] sm:$0xff] %v2448_v29 }
 0x367   : > { %v2271_v1 = vpop.f32.mrf.mxu1 }
 0x368   : > { %v2272_v31 = vadd.f32 %v2271_v1, %v2182_v8 }
 0x36a   : > { %v2361_v58 = vadd.f32 %v2360_v57, %v2272_v31 }
 0x36c   : > { %v2450_v27 = vadd.f32 %v2449_v42, %v2361_v58 }
 0x36e   : > { %2588 = vst [vmem:[%s5013_s1 + $0xd8] sm:$0xff] %v2450_v27 }
 0x36f   : > { %v2274_v2 = vpop.f32.mrf.mxu1 }
 0x370   : > { %v2275_v25 = vadd.f32 %v2274_v2, %v2185_v54 }
 0x372   : > { %v2364_v33 = vadd.f32 %v2363_v7, %v2275_v25  ;;  %2313 = vmatmul.bf16.gmra.mxu1 %v5171_v63  ;;  %v2375_v63 = vpop.f32.mrf.mxu2 }
 0x374   : > { %v2453_v44 = vadd.f32 %v2452_v23, %v2364_v33 }
 0x376   : > { %2590 = vst [vmem:[%s5013_s1 + $0xe8] sm:$0xff] %v2453_v44 }
 0x377   : > { %v2276_v26 = vpop.f32.mrf.mxu1 }
 0x378   : > { %v2277_v20 = vadd.f32 %v2276_v26, %v2187_v19 }
 0x37a   : > { %v2366_v50 = vadd.f32 %v2365_v10, %v2277_v20 }
 0x37c   : > { %v2455_v59 = vadd.f32 %v2454_v51, %v2366_v50 }
 0x37e   : > { %2592 = vst [vmem:[%s5013_s1 + $0xf8] sm:$0xff] %v2455_v59 }
 0x37f   : > { %v2279_v62 = vpop.f32.mrf.mxu1 }
 0x380   : > { %v2280_v34 = vadd.f32 %v2279_v62, %v2190_v9 }
 0x382   : > { %v2369_v48 = vadd.f32 %v2368_v30, %v2280_v34 }
 0x383   : > { %3823 = shalt.err (!%p3820_p13)
}
 0x384   : > { %3562 = dma.vmem_to_hbm [thread:$0]  (%p4021_p9), %s2645_s22, 64, %s2647_s23, %s2626_s7   ;;  %v2458_v47 = vadd.f32 %v2457_v32, %v2369_v48  ;;  %v2200_v22 = vpop.f32.mrf.mxu0  ;;  %v2378_v6 = vpop.f32.mrf.mxu2 }
 0x385   : > { %v2467_v56 = vpop.f32.mrf.mxu3  ;;  %s3551_s19 = sshll.u32 %s3910_s27, 9  ;;  %s5744_s9 = sld [smem:[#allocation72_spill]] }
 0x386   : > { %2594 = vst [vmem:[%s5013_s1 + $0x108] sm:$0xff] %v2458_v47  ;;  %s2658_s13 = sshll.u32 %s5013_s1, 4  ;;  %s2631_s21 = scalar_lea.sflag [#allocation13], %s4101_s6  ;;  %s2659_s13 = int_to_ptr.vmem [resolvable:$true] %s2658_s13 }
 0x387   : > { %v2281_v52 = vpop.f32.mrf.mxu1 }
 0x388   : > { %v2282_v36 = vadd.f32 %v2281_v52, %v2192_v15 }
 0x38a   : > { %v2371_v13 = vadd.f32 %v2370_v60, %v2282_v36 }
 0x38b   : > { %s2657_s10 = scalar_lea.hbm %s5744_s9, %s3551_s19  ;;  %s3844_s11 = scalar_lea.hbm %s5744_s9, 1024 }
 0x38c   : > { %v2460_v0 = vadd.f32 %v2459_v12, %v2371_v13  ;;  %v2202_v8 = vpop.f32.mrf.mxu0  ;;  %v2380_v57 = vpop.f32.mrf.mxu2  ;;  %s2660_s8 = sshll.u32 %s2657_s10, 4  ;;  %s2661_s8 = int_to_ptr.hbm [resolvable:$true] %s2660_s8 }
 0x38d   : > { %v2469_v42 = vpop.f32.mrf.mxu3  ;;  %s3838_s27 = sshra.s32 %s2661_s8, 4  ;;  %s3839_s27 = int_to_ptr.hbm [resolvable:$true] %s3838_s27 }
 0x38e   : > { %2596 = vst [vmem:[%s5013_s1 + $0x118] sm:$0xff] %v2460_v0  ;;  %s3840_s12 = scalar_lea.hbm %s3839_s27, 512  ;;  %p3845_p3 = scmp.lt.s32.totalorder %s3839_s27, %s5744_s9 }
 0x38f   : > { %v2284_v37 = vpop.f32.mrf.mxu1  ;;  %p3841_p0 = scmp.ne.s32.totalorder %s3839_s27, %s3840_s12  ;;  %p3846_p4 = scmp.lt.s32.totalorder %s3844_s11, %s3840_s12 }
 0x390   : > { %v2285_v49 = vadd.f32 %v2284_v37, %v2195_v3 }
 0x391   : > { %p3842_p1 = pnand %p3841_p0, %p4021_p9  ;;  %p3847_p5 = por %p3846_p4, %p3845_p3 }
 0x392   : > { %v2374_v46 = vadd.f32 %v2373_v14, %v2285_v49 }
 0x393   : > { %p3843_p2 = pneg %p3842_p1 }
 0x394   : > { %v2463_v16 = vadd.f32 %v2462_v21, %v2374_v46  ;;  %v2205_v54 = vpop.f32.mrf.mxu0  ;;  %v2383_v7 = vpop.f32.mrf.mxu2 }
 0x395   : > { %v2472_v23 = vpop.f32.mrf.mxu3  ;;  %p3848_p6 = pnand %p3847_p5, %p3843_p2 }
 0x396   : > { %2598 = vst [vmem:[%s5013_s1 + $0x128] sm:$0xff] %v2463_v16 }
 0x397   : > { %v2286_v39 = vpop.f32.mrf.mxu1 }
 0x398   : > { %v2287_v18 = vadd.f32 %v2286_v39, %v2197_v38 }
 0x39a   : > { %v2376_v11 = vadd.f32 %v2375_v63, %v2287_v18 }
 0x39c   : > { %v2465_v40 = vadd.f32 %v2464_v35, %v2376_v11  ;;  %v2207_v19 = vpop.f32.mrf.mxu0  ;;  %v2385_v10 = vpop.f32.mrf.mxu2 }
 0x39d   : > { %v2474_v51 = vpop.f32.mrf.mxu3 }
 0x39e   : > { %2600 = vst [vmem:[%s5013_s1 + $0x138] sm:$0xff] %v2465_v40 }
 0x39f   : > { %v2289_v61 = vpop.f32.mrf.mxu1 }
 0x3a0   : > { %v2290_v24 = vadd.f32 %v2289_v61, %v2200_v22 }
 0x3a2   : > { %v2379_v45 = vadd.f32 %v2378_v6, %v2290_v24 }
 0x3a4   : > { %v2468_v41 = vadd.f32 %v2467_v56, %v2379_v45  ;;  %v2210_v9 = vpop.f32.mrf.mxu0  ;;  %v2388_v30 = vpop.f32.mrf.mxu2 }
 0x3a5   : > { %v2477_v32 = vpop.f32.mrf.mxu3 }
 0x3a6   : > { %2602 = vst [vmem:[%s5013_s1 + $0x148] sm:$0xff] %v2468_v41 }
 0x3a7   : > { %v2291_v28 = vpop.f32.mrf.mxu1 }
 0x3a8   : > { %v2292_v53 = vadd.f32 %v2291_v28, %v2202_v8 }
 0x3aa   : > { %v2381_v5 = vadd.f32 %v2380_v57, %v2292_v53 }
 0x3ac   : > { %v2470_v43 = vadd.f32 %v2469_v42, %v2381_v5  ;;  %v2212_v15 = vpop.f32.mrf.mxu0  ;;  %v2390_v60 = vpop.f32.mrf.mxu2 }
 0x3ad   : > { %v2479_v12 = vpop.f32.mrf.mxu3 }
 0x3ae   : > { %2604 = vst [vmem:[%s5013_s1 + $0x158] sm:$0xff] %v2470_v43 }
 0x3af   : > { %v2294_v17 = vpop.f32.mrf.mxu1 }
 0x3b0   : > { %v2295_v4 = vadd.f32 %v2294_v17, %v2205_v54 }
 0x3b2   : > { %v2384_v55 = vadd.f32 %v2383_v7, %v2295_v4 }
 0x3b4   : > { %v2473_v29 = vadd.f32 %v2472_v23, %v2384_v55  ;;  %v2215_v3 = vpop.f32.mrf.mxu0  ;;  %v2393_v14 = vpop.f32.mrf.mxu2 }
 0x3b5   : > { %v2482_v21 = vpop.f32.mrf.mxu3 }
 0x3b6   : > { %2606 = vst [vmem:[%s5013_s1 + $0x168] sm:$0xff] %v2473_v29 }
 0x3b7   : > { %v2296_v1 = vpop.f32.mrf.mxu1 }
 0x3b8   : > { %v2297_v31 = vadd.f32 %v2296_v1, %v2207_v19 }
 0x3ba   : > { %v2386_v58 = vadd.f32 %v2385_v10, %v2297_v31 }
 0x3bc   : > { %v2475_v27 = vadd.f32 %v2474_v51, %v2386_v58  ;;  %v2217_v38 = vpop.f32.mrf.mxu0  ;;  %v2395_v63 = vpop.f32.mrf.mxu2 }
 0x3bd   : > { %v2484_v35 = vpop.f32.mrf.mxu3 }
 0x3be   : > { %2608 = vst [vmem:[%s5013_s1 + $0x178] sm:$0xff] %v2475_v27 }
 0x3bf   : > { %v2299_v2 = vpop.f32.mrf.mxu1 }
 0x3c0   : > { %v2300_v25 = vadd.f32 %v2299_v2, %v2210_v9 }
 0x3c2   : > { %v2389_v33 = vadd.f32 %v2388_v30, %v2300_v25 }
 0x3c4   : > { %v2478_v44 = vadd.f32 %v2477_v32, %v2389_v33  ;;  %v2220_v22 = vpop.f32.mrf.mxu0  ;;  %v2398_v6 = vpop.f32.mrf.mxu2 }
 0x3c5   : > { %v2487_v56 = vpop.f32.mrf.mxu3 }
 0x3c6   : > { %2610 = vst [vmem:[%s5013_s1 + $0x188] sm:$0xff] %v2478_v44 }
 0x3c7   : > { %v2301_v26 = vpop.f32.mrf.mxu1 }
 0x3c8   : > { %v2302_v20 = vadd.f32 %v2301_v26, %v2212_v15 }
 0x3ca   : > { %v2391_v50 = vadd.f32 %v2390_v60, %v2302_v20 }
 0x3cc   : > { %v2480_v59 = vadd.f32 %v2479_v12, %v2391_v50  ;;  %v2222_v8 = vpop.f32.mrf.mxu0  ;;  %v2400_v57 = vpop.f32.mrf.mxu2 }
 0x3cd   : > { %v2489_v42 = vpop.f32.mrf.mxu3 }
 0x3ce   : > { %2612 = vst [vmem:[%s5013_s1 + $0x198] sm:$0xff] %v2480_v59 }
 0x3cf   : > { %v2304_v62 = vpop.f32.mrf.mxu1 }
 0x3d0   : > { %v2305_v34 = vadd.f32 %v2304_v62, %v2215_v3 }
 0x3d2   : > { %v2394_v48 = vadd.f32 %v2393_v14, %v2305_v34 }
 0x3d4   : > { %v2483_v47 = vadd.f32 %v2482_v21, %v2394_v48  ;;  %v2225_v54 = vpop.f32.mrf.mxu0  ;;  %v2403_v7 = vpop.f32.mrf.mxu2 }
 0x3d5   : > { %v2492_v23 = vpop.f32.mrf.mxu3 }
 0x3d6   : > { %2614 = vst [vmem:[%s5013_s1 + $0x1a8] sm:$0xff] %v2483_v47 }
 0x3d7   : > { %v2306_v52 = vpop.f32.mrf.mxu1 }
 0x3d8   : > { %v2307_v36 = vadd.f32 %v2306_v52, %v2217_v38 }
 0x3da   : > { %v2396_v13 = vadd.f32 %v2395_v63, %v2307_v36 }
 0x3dc   : > { %v2485_v0 = vadd.f32 %v2484_v35, %v2396_v13  ;;  %v2227_v19 = vpop.f32.mrf.mxu0  ;;  %v2405_v10 = vpop.f32.mrf.mxu2 }
 0x3dd   : > { %v2494_v51 = vpop.f32.mrf.mxu3 }
 0x3de   : > { %2616 = vst [vmem:[%s5013_s1 + $0x1b8] sm:$0xff] %v2485_v0 }
 0x3df   : > { %v2309_v37 = vpop.f32.mrf.mxu1 }
 0x3e0   : > { %v2310_v49 = vadd.f32 %v2309_v37, %v2220_v22 }
 0x3e2   : > { %v2399_v46 = vadd.f32 %v2398_v6, %v2310_v49 }
 0x3e4   : > { %v2488_v16 = vadd.f32 %v2487_v56, %v2399_v46 }
 0x3e6   : > { %2618 = vst [vmem:[%s5013_s1 + $0x1c8] sm:$0xff] %v2488_v16 }
 0x3e7   : > { %v2311_v39 = vpop.f32.mrf.mxu1 }
 0x3e8   : > { %v2312_v18 = vadd.f32 %v2311_v39, %v2222_v8 }
 0x3ea   : > { %v2401_v11 = vadd.f32 %v2400_v57, %v2312_v18 }
 0x3ec   : > { %v2490_v40 = vadd.f32 %v2489_v42, %v2401_v11 }
 0x3ee   : > { %2620 = vst [vmem:[%s5013_s1 + $0x1d8] sm:$0xff] %v2490_v40 }
 0x3ef   : > { %v2314_v61 = vpop.f32.mrf.mxu1 }
 0x3f0   : > { %v2315_v24 = vadd.f32 %v2314_v61, %v2225_v54 }
 0x3f2   : > { %v2404_v45 = vadd.f32 %v2403_v7, %v2315_v24 }
 0x3f4   : > { %v2493_v41 = vadd.f32 %v2492_v23, %v2404_v45 }
 0x3f6   : > { %2622 = vst [vmem:[%s5013_s1 + $0x1e8] sm:$0xff] %v2493_v41 }
 0x3f7   : > { %v2316_v28 = vpop.f32.mrf.mxu1 }
 0x3f8   : > { %v2317_v53 = vadd.f32 %v2316_v28, %v2227_v19 }
 0x3fa   : > { %v2406_v5 = vadd.f32 %v2405_v10, %v2317_v53 }
 0x3fc   : > { %v2495_v43 = vadd.f32 %v2494_v51, %v2406_v5 }
 0x3fe   : > { %2624 = vst [vmem:[%s5013_s1 + $0x1f8] sm:$0xff] %v2495_v43 }
 0x3ff   : > { %3851 = shalt.err (!%p3848_p6)
}
 0x400   : > { %s3924_s6 = smov 256   ;;  %s3925_s1 = smov 16  }
 0x401   : > { %3563 = dma.vmem_to_hbm [thread:$0]  (%p4021_p9), %s2659_s13, 8192, %s2661_s8, %s2631_s21, %s3924_s6, %s3924_s6, %s3925_s1  }
 0x402 PF: > { %s5745_s7 = sld [smem:[#allocation19_spill]]  ;;  %p3583_p7 = pnand %p2869_p12, %p4028_p11 }
 0x403   : > { %s5747_s17 = sld [smem:[#allocation22_spill]] }
 0x404   : > { %p3584_p8 = pneg %p3583_p7 }
 0x408   : > { %s2675_s5 = sand.u32 1, %s5745_s7  }
 0x409   : > { %s2676_s28 = scalar_lea.sflag [#allocation4], %s2675_s5 }
 0x40a   : > { %3889 = dma.done.wait (%p3584_p8), %s2676_s28, 64  }
 0x40b   : > { %3891 = vsyncadd (%p3584_p8), %s2676_s28, 4294967232  ;;  %s2686_s15 = scalar_lea.sflag [#allocation13], %s2675_s5 }
 0x40c   : > { %3893 = dma.done.wait (%p3584_p8), %s2686_s15, 8192  }
 0x40d   : > { %3895 = vsyncadd (%p3584_p8), %s2686_s15, 4294959104  ;;  %s33_s29 = sadd.s32 1, %s5747_s17   ;;  %s5748_s16 = sld [smem:[#allocation20_spill]] }
 0x40e   : > { %p30_p10 = scmp.ge.s32.totalorder %s33_s29, 4   ;;  %s5749_s26 = sld [smem:[#allocation25_spill]] }
 0x40f   : > { %s5750_s27 = sld [smem:[#allocation21_spill]]  ;;  %s5752_s24 = smov %s3902_s25 }
 0x410   : > { %s5751_s28 = sld [smem:[#allocation23_spill]]  ;;  %32 = sbr.rel (!%p30_p10) target bundleno = 18 (0x12), region = 158 }
 0x413   : > { %s5753_s25 = smov %s5748_s16 }
 0x415   :  { %2692 = vsyncpa [#allocation3], 1 }
 0x416   :  { %2694 = vsyncpa [#allocation3 + $0x1], 1 }
 0x417   :  { %2695 = vsyncpa [#allocation6], 1 }
 0x418   :  { %2697 = vsyncpa [#allocation6 + $0x1], 1 }
 0x419   :  { %2698 = vsyncpa [#allocation9], 1 }
 0x41a   :  { %2700 = vsyncpa [#allocation9 + $0x1], 1 }
 0x41b   :  { %2701 = vsyncpa [#allocation4], 1 }
 0x41c   :  { %2703 = vsyncpa [#allocation4 + $0x1], 1 }
 0x41d   :  { %2704 = vsyncpa [#allocation13], 1 }
 0x41e   :  { %2706 = vsyncpa [#allocation13 + $0x1], 1 }

</bundles_post_ra>
